<compile_context>
chip_gen: v5e
topology: v5e:2x2
jax: 0.10.0
libtpu: 0.0.40
codegen_flags: <defaults>
</compile_context>

<pallas_src>
import jax
import jax.numpy as jnp
import numpy as np
from jax.experimental import pallas as pl
from jax.experimental.pallas import tpu as pltpu

# ---------------- configuration (small, forward-implied shapes) ---------------
NUM_LAYER = 3        # num_layer (must be > 1)
EMB_DIM   = 32       # emb_dim
NUM_TASKS = 8        # num_tasks
TASK_PAD  = 128      # lane-dense output width (sliced back to NUM_TASKS)
JK        = "last"
POOLING   = "mean"

N_GBATCH  = 4        # grid axis: independent batched graphs (mini-batches)
N_NODES   = 128      # nodes per batched graph (lane-dense adjacency)
N_EDGES   = 192      # directed edges per batched graph (before self loops)
N_GRAPHS  = 4        # graphs packed into each batched graph

NUM_ATOM_TYPE      = 120
NUM_CHIRALITY_TAG  = 3
NUM_BOND_TYPE      = 6   # incl. self-loop token (= 4)
NUM_BOND_DIRECTION = 3

BN_EPS = 1e-5


# ------------------------------- Pallas kernel --------------------------------
def _gnn_kernel(node_ref, eaggr_ref, adj_ref, pool_ref,
                w1_ref, b1_ref, w2_ref, b2_ref, wp_ref, bp_ref, out_ref):
    """One grid step = full GNN_graphpred forward on one batched graph.

    Per-graph blocks (VMEM):
      node_ref : (1, N, D)       initial node embeddings
      eaggr_ref: (1, L, N, D)    A @ edge_emb (pre-scattered edge embeddings)
      adj_ref  : (1, N, N)       adj = A @ S
      pool_ref : (1, B, N)       mean-pool matrix
      out_ref  : (1, B, TASK_PAD)
    Shared (VMEM-resident across grid steps, constant index_map):
      w1_ref (L, D, 2D), b1_ref (L, 1, 2D), w2_ref (L, 2D, D) [BN folded],
      b2_ref (L, 1, D), wp_ref (D, TASK_PAD), bp_ref (1, TASK_PAD)
    """
    h     = node_ref[0]                                   # (N, D)
    adj   = adj_ref[0]                                    # (N, N)
    eaggr = eaggr_ref[0]                                  # (L, N, D)

    for l in range(NUM_LAYER):                            # static unroll
        # fused GINConv gather+scatter: aggr = adj @ h + (A @ edge_emb_l)
        aggr = jnp.dot(adj, h, preferred_element_type=jnp.float32) + eaggr[l]

        # GINConv mlp (eval BatchNorm folded into the second linear)
        h1 = jnp.dot(aggr, w1_ref[l], preferred_element_type=jnp.float32) + b1_ref[l]
        h1 = jnp.maximum(h1, 0.0)
        h  = jnp.dot(h1, w2_ref[l], preferred_element_type=jnp.float32) + b2_ref[l]

        # inter-layer ReLU (not applied after the last layer; JK='last')
        if l < NUM_LAYER - 1:
            h = jnp.maximum(h, 0.0)

    # global mean pool + graph_pred_linear (lane-dense padded head)
    g = jnp.dot(pool_ref[0], h, preferred_element_type=jnp.float32)       # (B, D)
    pred = jnp.dot(g, wp_ref[...], preferred_element_type=jnp.float32) + bp_ref[...]
    out_ref[...] = pred[None]                                             # (1, B, TASK_PAD)


# --------------------------- weight-only prep (hoisted) ------------------------
def pack_params(params):
    """Run once per model: fold eval-mode BatchNorm into the 2nd GIN linear and
    pad the prediction head to a lane-dense width. Independent of graph inputs."""
    (w1, b1, w2, b2, gamma, beta, rm, rv, wp, bp) = params
    scale = gamma * jax.lax.rsqrt(rv + BN_EPS)                     # (L, 1, D)
    w2f = w2 * scale                                               # (L, 2D, D)
    b2f = (b2 - rm) * scale + beta                                 # (L, 1, D)
    wp_pad = jnp.pad(wp, ((0, 0), (0, TASK_PAD - NUM_TASKS)))      # (D, TASK_PAD)
    bp_pad = jnp.pad(bp, ((0, 0), (0, TASK_PAD - NUM_TASKS)))      # (1, TASK_PAD)
    return (w1, b1, w2f, b2f, wp_pad, bp_pad)


# ---------------------------- jitted forward path ------------------------------
def _forward_impl(node_emb, edge_emb_all, S, A, P, packed):
    w1, b1, w2f, b2f, wp_pad, bp_pad = packed
    G, N, D = node_emb.shape
    L, B, T = NUM_LAYER, N_GRAPHS, TASK_PAD

    # graph-dependent algebraic fusion of the one-hot gather / scatter
    adj       = jnp.einsum("gne,gem->gnm", A, S)                   # (G, N, N)
    edge_aggr = jnp.einsum("gne,gled->glnd", A, edge_emb_all)      # (G, L, N, D)

    flops = G * (L * (2 * N * N * D + 2 * N * D * (2 * D) + 2 * N * (2 * D) * D)
                 + 2 * B * N * D + 2 * B * D * T)
    bytes_accessed = 4 * (node_emb.size + edge_aggr.size + adj.size + P.size
                          + w1.size + b1.size + w2f.size + b2f.size
                          + wp_pad.size + bp_pad.size + G * B * T)

    out = pl.pallas_call(
        _gnn_kernel,
        grid=(G,),
        in_specs=[
            pl.BlockSpec((1, N, D),    lambda g: (g, 0, 0)),       # node emb
            pl.BlockSpec((1, L, N, D), lambda g: (g, 0, 0, 0)),    # edge aggr
            pl.BlockSpec((1, N, N),    lambda g: (g, 0, 0)),       # adj (lane-dense)
            pl.BlockSpec((1, B, N),    lambda g: (g, 0, 0)),       # pool
            pl.BlockSpec((L, D, 2 * D), lambda g: (0, 0, 0)),      # w1   (resident)
            pl.BlockSpec((L, 1, 2 * D), lambda g: (0, 0, 0)),      # b1   (resident)
            pl.BlockSpec((L, 2 * D, D), lambda g: (0, 0, 0)),      # w2'  (resident)
            pl.BlockSpec((L, 1, D),     lambda g: (0, 0, 0)),      # b2'  (resident)
            pl.BlockSpec((D, T),        lambda g: (0, 0)),         # wp   (lane-dense)
            pl.BlockSpec((1, T),        lambda g: (0, 0)),         # bp
        ],
        out_specs=pl.BlockSpec((1, B, T), lambda g: (g, 0, 0)),
        out_shape=jax.ShapeDtypeStruct((G, B, T), jnp.float32),
        compiler_params=pltpu.CompilerParams(
            dimension_semantics=("parallel",)),                    # v7x: 2 TCs
        cost_estimate=pl.CostEstimate(flops=flops, transcendentals=0,
                                      bytes_accessed=bytes_accessed),
    )(node_emb, edge_aggr, adj, P, w1, b1, w2f, b2f, wp_pad, bp_pad)

    # strip lane padding, flatten graph axis -> (total_graphs, num_tasks)
    return out[..., :NUM_TASKS].reshape(G * B, NUM_TASKS)


gnn_graphpred_forward = jax.jit(_forward_impl)


# ------------------------------- pure-JAX reference ---------------------------
def reference_forward(node_emb, edge_emb_all, S, A, P, params):
    """Unfused reference with explicit gather/scatter and un-folded BN."""
    (w1, b1, w2, b2, gamma, beta, rm, rv, wp, bp) = params
    h = node_emb                                                    # (G, N, D)
    for l in range(NUM_LAYER):
        msg  = jnp.einsum("gen,gnd->ged", S, h) + edge_emb_all[:, l]
        aggr = jnp.einsum("gne,ged->gnd", A, msg)
        h1 = jnp.maximum(jnp.matmul(aggr, w1[l]) + b1[l], 0.0)
        h2 = jnp.matmul(h1, w2[l]) + b2[l]
        h2 = (h2 - rm[l]) * jax.lax.rsqrt(rv[l] + BN_EPS) * gamma[l] + beta[l]
        if l < NUM_LAYER - 1:
            h2 = jnp.maximum(h2, 0.0)
        h = h2
    g = jnp.einsum("gbn,gnd->gbd", P, h)
    out = jnp.matmul(g, wp) + bp
    return out.reshape(-1, NUM_TASKS)


# ----------------------------------- main --------------------------------------
if __name__ == "__main__":
    key = jax.random.PRNGKey(0)
    keys = jax.random.split(key, 16)

    D, L, T = EMB_DIM, NUM_LAYER, NUM_TASKS
    G, N, E, B = N_GBATCH, N_NODES, N_EDGES, N_GRAPHS

    # ---- synthetic graph inputs: G batched graphs, B graphs / N nodes each ----
    x_atoms = jnp.stack(
        [jax.random.randint(keys[0], (G, N), 0, NUM_ATOM_TYPE),
         jax.random.randint(keys[1], (G, N), 0, NUM_CHIRALITY_TAG)], axis=-1)      # (G, N, 2)
    edge_index = jax.random.randint(keys[2], (G, 2, E), 0, N)                       # (G, 2, E)
    edge_attr = jnp.stack(
        [jax.random.randint(keys[3], (G, E), 0, 4),          # real bond types 0..3
         jax.random.randint(keys[4], (G, E), 0, NUM_BOND_DIRECTION)], axis=-1)      # (G, E, 2)
    batch = jnp.repeat(jnp.arange(B, dtype=jnp.int32), N // B)                      # (N,)

    # ---- parameters (deterministic synthetic init) ----
    def nrm(k, shape, scale=0.1):
        return (scale * jax.random.normal(k, shape)).astype(jnp.float32)

    atom_emb1 = nrm(keys[5], (NUM_ATOM_TYPE, D))
    atom_emb2 = nrm(keys[6], (NUM_CHIRALITY_TAG, D))
    bond_emb1 = nrm(keys[7], (L, NUM_BOND_TYPE, D))       # per-layer GINConv edge emb
    bond_emb2 = nrm(keys[8], (L, NUM_BOND_DIRECTION, D))

    w1 = nrm(keys[9],  (L, D, 2 * D))     # GINConv mlp Linear(D, 2D)  (in, out)
    b1 = nrm(keys[10], (L, 1, 2 * D))
    w2 = nrm(keys[11], (L, 2 * D, D))     # GINConv mlp Linear(2D, D)
    b2 = nrm(keys[12], (L, 1, D))
    gamma = jnp.ones((L, 1, D), jnp.float32)              # BatchNorm1d defaults
    beta  = jnp.zeros((L, 1, D), jnp.float32)
    rm    = jnp.zeros((L, 1, D), jnp.float32)
    rv    = jnp.ones((L, 1, D), jnp.float32)
    wp = nrm(keys[13], (D, T))                             # graph_pred_linear (in, out)
    bp = nrm(keys[14], (1, T))
    params = (w1, b1, w2, b2, gamma, beta, rm, rv, wp, bp)

    # ---- glue: embedding lookups, self-loops, one-hot gather/scatter/pool ----
    node_emb = (atom_emb1[x_atoms[..., 0]]
                + atom_emb2[x_atoms[..., 1]]).astype(jnp.float32)                    # (G, N, D)

    self_loop_idx = jnp.broadcast_to(
        jnp.arange(N, dtype=jnp.int32)[None, None, :], (G, 2, N))                    # (G, 2, N)
    full_edge_index = jnp.concatenate([edge_index, self_loop_idx], axis=-1)          # (G, 2, E+N)
    self_loop_attr = jnp.stack([jnp.full((G, N), 4, jnp.int32),
                                jnp.zeros((G, N), jnp.int32)], axis=-1)              # (G, N, 2)
    full_edge_attr = jnp.concatenate([edge_attr, self_loop_attr], axis=1)            # (G, E+N, 2)

    edge_emb_all = (bond_emb1[:, full_edge_attr[..., 0], :]
                    + bond_emb2[:, full_edge_attr[..., 1], :])                       # (L, G, E+N, D)
    edge_emb_all = jnp.transpose(edge_emb_all, (1, 0, 2, 3)).astype(jnp.float32)     # (G, L, E+N, D)

    src, dst = full_edge_index[:, 0, :], full_edge_index[:, 1, :]                    # (G, E+N)
    node_ids = jnp.arange(N)
    S = (src[:, :, None] == node_ids[None, None, :]).astype(jnp.float32)             # (G, E+N, N)
    A = (node_ids[None, :, None] == dst[:, None, :]).astype(jnp.float32)             # (G, N, E+N)

    memb = (jnp.arange(B)[:, None] == batch[None, :]).astype(jnp.float32)            # (B, N)
    Pm = memb / jnp.maximum(memb.sum(axis=1, keepdims=True), 1.0)                    # mean pool
    P = jnp.broadcast_to(Pm[None], (G, B, N))                                        # (G, B, N)

    # ---- one-time weight prep (hoisted out of the per-forward path) ----
    packed = pack_params(params)

    # ---- run kernel (jitted forward: fusion einsums + pallas_call) ----
    out = gnn_graphpred_forward(node_emb, edge_emb_all, S, A, P, packed)
    out = jax.block_until_ready(out)

    ref = reference_forward(node_emb, edge_emb_all, S, A, P, params)
    np.testing.assert_allclose(np.asarray(out), np.asarray(ref), atol=1e-4, rtol=1e-4)
    assert out.shape == (G * B, T)

    print("KERNEL_OK")
</pallas_src>

<mosaic_0001>
module attributes {stable_mosaic.version = 11 : i64} {
  func.func @_gnn_kernel(%arg0: i32, %arg1: memref<1x128x32xf32, #tpu.memory_space<vmem>>, %arg2: memref<1x3x128x32xf32, #tpu.memory_space<vmem>>, %arg3: memref<1x128x128xf32, #tpu.memory_space<vmem>>, %arg4: memref<1x4x128xf32, #tpu.memory_space<vmem>>, %arg5: memref<3x32x64xf32, #tpu.memory_space<vmem>>, %arg6: memref<3x1x64xf32, #tpu.memory_space<vmem>>, %arg7: memref<3x64x32xf32, #tpu.memory_space<vmem>>, %arg8: memref<3x1x32xf32, #tpu.memory_space<vmem>>, %arg9: memref<32x128xf32, #tpu.memory_space<vmem>>, %arg10: memref<1x128xf32, #tpu.memory_space<vmem>>, %arg11: memref<1x4x128xf32, #tpu.memory_space<vmem>>) attributes {dimension_semantics = [#tpu.dimension_semantics<parallel>], iteration_bounds = array<i64: 4>, scalar_prefetch = 0 : i64, scratch_operands = 0 : i64, tpu.core_type = #tpu.core_type<tc>, window_params = [{transform_indices = @transform_0, window_bounds = array<i64: 1, 128, 32>}, {transform_indices = @transform_1, window_bounds = array<i64: 1, 3, 128, 32>}, {transform_indices = @transform_2, window_bounds = array<i64: 1, 128, 128>}, {transform_indices = @transform_3, window_bounds = array<i64: 1, 4, 128>}, {pipeline_mode = #tpu.pipeline_mode<synchronous>, transform_indices = @transform_4, window_bounds = array<i64: 3, 32, 64>}, {pipeline_mode = #tpu.pipeline_mode<synchronous>, transform_indices = @transform_5, window_bounds = array<i64: 3, 1, 64>}, {pipeline_mode = #tpu.pipeline_mode<synchronous>, transform_indices = @transform_6, window_bounds = array<i64: 3, 64, 32>}, {pipeline_mode = #tpu.pipeline_mode<synchronous>, transform_indices = @transform_7, window_bounds = array<i64: 3, 1, 32>}, {pipeline_mode = #tpu.pipeline_mode<synchronous>, transform_indices = @transform_8, window_bounds = array<i64: 32, 128>}, {pipeline_mode = #tpu.pipeline_mode<synchronous>, transform_indices = @transform_9, window_bounds = array<i64: 1, 128>}, {transform_indices = @transform_10, window_bounds = array<i64: 1, 4, 128>}]} {
    %c0 = arith.constant 0 : index
    %c0_0 = arith.constant 0 : index
    %c0_1 = arith.constant 0 : index
    %0 = vector.load %arg1[%c0, %c0_0, %c0_1] : memref<1x128x32xf32, #tpu.memory_space<vmem>>, vector<1x128x32xf32>
    %1 = vector.shape_cast %0 : vector<1x128x32xf32> to vector<128x32xf32>
    %c0_2 = arith.constant 0 : index
    %c0_3 = arith.constant 0 : index
    %c0_4 = arith.constant 0 : index
    %2 = vector.load %arg3[%c0_2, %c0_3, %c0_4] : memref<1x128x128xf32, #tpu.memory_space<vmem>>, vector<1x128x128xf32>
    %3 = vector.shape_cast %2 : vector<1x128x128xf32> to vector<128x128xf32>
    %c0_5 = arith.constant 0 : index
    %c0_6 = arith.constant 0 : index
    %c0_7 = arith.constant 0 : index
    %c0_8 = arith.constant 0 : index
    %4 = vector.load %arg2[%c0_5, %c0_6, %c0_7, %c0_8] : memref<1x3x128x32xf32, #tpu.memory_space<vmem>>, vector<1x3x128x32xf32>
    %5 = vector.shape_cast %4 : vector<1x3x128x32xf32> to vector<3x128x32xf32>
    %cst = arith.constant dense<0.000000e+00> : vector<128x32xf32>
    %6 = tpu.matmul %3, %1, %cst {dimension_numbers = #tpu.dot_dimension_numbers<[1], [0], [0], [1], [0, 0, 1, 1], [], []>} : vector<128x128xf32>, vector<128x32xf32>, vector<128x32xf32> -> vector<128x32xf32>
    %7 = vector.extract_strided_slice %5 {offsets = [0, 0, 0], sizes = [1, 128, 32], strides = [1, 1, 1]} : vector<3x128x32xf32> to vector<1x128x32xf32>
    %8 = vector.shape_cast %7 : vector<1x128x32xf32> to vector<128x32xf32>
    %9 = arith.addf %6, %8 : vector<128x32xf32>
    %c0_9 = arith.constant 0 : index
    %c0_10 = arith.constant 0 : index
    %c0_11 = arith.constant 0 : index
    %10 = vector.load %arg5[%c0_9, %c0_10, %c0_11] : memref<3x32x64xf32, #tpu.memory_space<vmem>>, vector<1x32x64xf32>
    %11 = vector.shape_cast %10 : vector<1x32x64xf32> to vector<32x64xf32>
    %cst_12 = arith.constant dense<0.000000e+00> : vector<128x64xf32>
    %12 = tpu.matmul %9, %11, %cst_12 {dimension_numbers = #tpu.dot_dimension_numbers<[1], [0], [0], [1], [0, 0, 1, 1], [], []>} : vector<128x32xf32>, vector<32x64xf32>, vector<128x64xf32> -> vector<128x64xf32>
    %c0_13 = arith.constant 0 : index
    %c0_14 = arith.constant 0 : index
    %c0_15 = arith.constant 0 : index
    %13 = vector.load %arg6[%c0_13, %c0_14, %c0_15] : memref<3x1x64xf32, #tpu.memory_space<vmem>>, vector<1x1x64xf32>
    %14 = vector.shape_cast %13 : vector<1x1x64xf32> to vector<1x64xf32>
    %15 = vector.broadcast %14 : vector<1x64xf32> to vector<128x64xf32>
    %16 = arith.addf %12, %15 : vector<128x64xf32>
    %cst_16 = arith.constant 0.000000e+00 : f32
    %17 = vector.broadcast %cst_16 : f32 to vector<128x64xf32>
    %18 = arith.maximumf %16, %17 : vector<128x64xf32>
    %c0_17 = arith.constant 0 : index
    %c0_18 = arith.constant 0 : index
    %c0_19 = arith.constant 0 : index
    %19 = vector.load %arg7[%c0_17, %c0_18, %c0_19] : memref<3x64x32xf32, #tpu.memory_space<vmem>>, vector<1x64x32xf32>
    %20 = vector.shape_cast %19 : vector<1x64x32xf32> to vector<64x32xf32>
    %cst_20 = arith.constant dense<0.000000e+00> : vector<128x32xf32>
    %21 = tpu.matmul %18, %20, %cst_20 {dimension_numbers = #tpu.dot_dimension_numbers<[1], [0], [0], [1], [0, 0, 1, 1], [], []>} : vector<128x64xf32>, vector<64x32xf32>, vector<128x32xf32> -> vector<128x32xf32>
    %c0_21 = arith.constant 0 : index
    %c0_22 = arith.constant 0 : index
    %c0_23 = arith.constant 0 : index
    %22 = vector.load %arg8[%c0_21, %c0_22, %c0_23] : memref<3x1x32xf32, #tpu.memory_space<vmem>>, vector<1x1x32xf32>
    %23 = vector.shape_cast %22 : vector<1x1x32xf32> to vector<1x32xf32>
    %24 = vector.broadcast %23 : vector<1x32xf32> to vector<128x32xf32>
    %25 = arith.addf %21, %24 : vector<128x32xf32>
    %cst_24 = arith.constant 0.000000e+00 : f32
    %26 = vector.broadcast %cst_24 : f32 to vector<128x32xf32>
    %27 = arith.maximumf %25, %26 : vector<128x32xf32>
    %cst_25 = arith.constant dense<0.000000e+00> : vector<128x32xf32>
    %28 = tpu.matmul %3, %27, %cst_25 {dimension_numbers = #tpu.dot_dimension_numbers<[1], [0], [0], [1], [0, 0, 1, 1], [], []>} : vector<128x128xf32>, vector<128x32xf32>, vector<128x32xf32> -> vector<128x32xf32>
    %29 = vector.extract_strided_slice %5 {offsets = [1, 0, 0], sizes = [1, 128, 32], strides = [1, 1, 1]} : vector<3x128x32xf32> to vector<1x128x32xf32>
    %30 = vector.shape_cast %29 : vector<1x128x32xf32> to vector<128x32xf32>
    %31 = arith.addf %28, %30 : vector<128x32xf32>
    %c1 = arith.constant 1 : index
    %c0_26 = arith.constant 0 : index
    %c0_27 = arith.constant 0 : index
    %32 = vector.load %arg5[%c1, %c0_26, %c0_27] : memref<3x32x64xf32, #tpu.memory_space<vmem>>, vector<1x32x64xf32>
    %33 = vector.shape_cast %32 : vector<1x32x64xf32> to vector<32x64xf32>
    %cst_28 = arith.constant dense<0.000000e+00> : vector<128x64xf32>
    %34 = tpu.matmul %31, %33, %cst_28 {dimension_numbers = #tpu.dot_dimension_numbers<[1], [0], [0], [1], [0, 0, 1, 1], [], []>} : vector<128x32xf32>, vector<32x64xf32>, vector<128x64xf32> -> vector<128x64xf32>
    %c1_29 = arith.constant 1 : index
    %c0_30 = arith.constant 0 : index
    %c0_31 = arith.constant 0 : index
    %35 = vector.load %arg6[%c1_29, %c0_30, %c0_31] : memref<3x1x64xf32, #tpu.memory_space<vmem>>, vector<1x1x64xf32>
    %36 = vector.shape_cast %35 : vector<1x1x64xf32> to vector<1x64xf32>
    %37 = vector.broadcast %36 : vector<1x64xf32> to vector<128x64xf32>
    %38 = arith.addf %34, %37 : vector<128x64xf32>
    %cst_32 = arith.constant 0.000000e+00 : f32
    %39 = vector.broadcast %cst_32 : f32 to vector<128x64xf32>
    %40 = arith.maximumf %38, %39 : vector<128x64xf32>
    %c1_33 = arith.constant 1 : index
    %c0_34 = arith.constant 0 : index
    %c0_35 = arith.constant 0 : index
    %41 = vector.load %arg7[%c1_33, %c0_34, %c0_35] : memref<3x64x32xf32, #tpu.memory_space<vmem>>, vector<1x64x32xf32>
    %42 = vector.shape_cast %41 : vector<1x64x32xf32> to vector<64x32xf32>
    %cst_36 = arith.constant dense<0.000000e+00> : vector<128x32xf32>
    %43 = tpu.matmul %40, %42, %cst_36 {dimension_numbers = #tpu.dot_dimension_numbers<[1], [0], [0], [1], [0, 0, 1, 1], [], []>} : vector<128x64xf32>, vector<64x32xf32>, vector<128x32xf32> -> vector<128x32xf32>
    %c1_37 = arith.constant 1 : index
    %c0_38 = arith.constant 0 : index
    %c0_39 = arith.constant 0 : index
    %44 = vector.load %arg8[%c1_37, %c0_38, %c0_39] : memref<3x1x32xf32, #tpu.memory_space<vmem>>, vector<1x1x32xf32>
    %45 = vector.shape_cast %44 : vector<1x1x32xf32> to vector<1x32xf32>
    %46 = vector.broadcast %45 : vector<1x32xf32> to vector<128x32xf32>
    %47 = arith.addf %43, %46 : vector<128x32xf32>
    %cst_40 = arith.constant 0.000000e+00 : f32
    %48 = vector.broadcast %cst_40 : f32 to vector<128x32xf32>
    %49 = arith.maximumf %47, %48 : vector<128x32xf32>
    %cst_41 = arith.constant dense<0.000000e+00> : vector<128x32xf32>
    %50 = tpu.matmul %3, %49, %cst_41 {dimension_numbers = #tpu.dot_dimension_numbers<[1], [0], [0], [1], [0, 0, 1, 1], [], []>} : vector<128x128xf32>, vector<128x32xf32>, vector<128x32xf32> -> vector<128x32xf32>
    %51 = vector.extract_strided_slice %5 {offsets = [2, 0, 0], sizes = [1, 128, 32], strides = [1, 1, 1]} : vector<3x128x32xf32> to vector<1x128x32xf32>
    %52 = vector.shape_cast %51 : vector<1x128x32xf32> to vector<128x32xf32>
    %53 = arith.addf %50, %52 : vector<128x32xf32>
    %c2 = arith.constant 2 : index
    %c0_42 = arith.constant 0 : index
    %c0_43 = arith.constant 0 : index
    %54 = vector.load %arg5[%c2, %c0_42, %c0_43] : memref<3x32x64xf32, #tpu.memory_space<vmem>>, vector<1x32x64xf32>
    %55 = vector.shape_cast %54 : vector<1x32x64xf32> to vector<32x64xf32>
    %cst_44 = arith.constant dense<0.000000e+00> : vector<128x64xf32>
    %56 = tpu.matmul %53, %55, %cst_44 {dimension_numbers = #tpu.dot_dimension_numbers<[1], [0], [0], [1], [0, 0, 1, 1], [], []>} : vector<128x32xf32>, vector<32x64xf32>, vector<128x64xf32> -> vector<128x64xf32>
    %c2_45 = arith.constant 2 : index
    %c0_46 = arith.constant 0 : index
    %c0_47 = arith.constant 0 : index
    %57 = vector.load %arg6[%c2_45, %c0_46, %c0_47] : memref<3x1x64xf32, #tpu.memory_space<vmem>>, vector<1x1x64xf32>
    %58 = vector.shape_cast %57 : vector<1x1x64xf32> to vector<1x64xf32>
    %59 = vector.broadcast %58 : vector<1x64xf32> to vector<128x64xf32>
    %60 = arith.addf %56, %59 : vector<128x64xf32>
    %cst_48 = arith.constant 0.000000e+00 : f32
    %61 = vector.broadcast %cst_48 : f32 to vector<128x64xf32>
    %62 = arith.maximumf %60, %61 : vector<128x64xf32>
    %c2_49 = arith.constant 2 : index
    %c0_50 = arith.constant 0 : index
    %c0_51 = arith.constant 0 : index
    %63 = vector.load %arg7[%c2_49, %c0_50, %c0_51] : memref<3x64x32xf32, #tpu.memory_space<vmem>>, vector<1x64x32xf32>
    %64 = vector.shape_cast %63 : vector<1x64x32xf32> to vector<64x32xf32>
    %cst_52 = arith.constant dense<0.000000e+00> : vector<128x32xf32>
    %65 = tpu.matmul %62, %64, %cst_52 {dimension_numbers = #tpu.dot_dimension_numbers<[1], [0], [0], [1], [0, 0, 1, 1], [], []>} : vector<128x64xf32>, vector<64x32xf32>, vector<128x32xf32> -> vector<128x32xf32>
    %c2_53 = arith.constant 2 : index
    %c0_54 = arith.constant 0 : index
    %c0_55 = arith.constant 0 : index
    %66 = vector.load %arg8[%c2_53, %c0_54, %c0_55] : memref<3x1x32xf32, #tpu.memory_space<vmem>>, vector<1x1x32xf32>
    %67 = vector.shape_cast %66 : vector<1x1x32xf32> to vector<1x32xf32>
    %68 = vector.broadcast %67 : vector<1x32xf32> to vector<128x32xf32>
    %69 = arith.addf %65, %68 : vector<128x32xf32>
    %c0_56 = arith.constant 0 : index
    %c0_57 = arith.constant 0 : index
    %c0_58 = arith.constant 0 : index
    %70 = vector.load %arg4[%c0_56, %c0_57, %c0_58] : memref<1x4x128xf32, #tpu.memory_space<vmem>>, vector<1x4x128xf32>
    %71 = vector.shape_cast %70 : vector<1x4x128xf32> to vector<4x128xf32>
    %cst_59 = arith.constant dense<0.000000e+00> : vector<4x32xf32>
    %72 = tpu.matmul %71, %69, %cst_59 {dimension_numbers = #tpu.dot_dimension_numbers<[1], [0], [0], [1], [0, 0, 1, 1], [], []>} : vector<4x128xf32>, vector<128x32xf32>, vector<4x32xf32> -> vector<4x32xf32>
    %c0_60 = arith.constant 0 : index
    %c0_61 = arith.constant 0 : index
    %73 = vector.load %arg9[%c0_60, %c0_61] : memref<32x128xf32, #tpu.memory_space<vmem>>, vector<32x128xf32>
    %cst_62 = arith.constant dense<0.000000e+00> : vector<4x128xf32>
    %74 = tpu.matmul %72, %73, %cst_62 {dimension_numbers = #tpu.dot_dimension_numbers<[1], [0], [0], [1], [0, 0, 1, 1], [], []>} : vector<4x32xf32>, vector<32x128xf32>, vector<4x128xf32> -> vector<4x128xf32>
    %c0_63 = arith.constant 0 : index
    %c0_64 = arith.constant 0 : index
    %75 = vector.load %arg10[%c0_63, %c0_64] : memref<1x128xf32, #tpu.memory_space<vmem>>, vector<1x128xf32>
    %76 = vector.broadcast %75 : vector<1x128xf32> to vector<4x128xf32>
    %77 = arith.addf %74, %76 : vector<4x128xf32>
    %78 = vector.shape_cast %77 : vector<4x128xf32> to vector<1x4x128xf32>
    %c0_65 = arith.constant 0 : index
    %c0_66 = arith.constant 0 : index
    %c0_67 = arith.constant 0 : index
    %79 = vector.load %arg11[%c0_65, %c0_66, %c0_67] : memref<1x4x128xf32, #tpu.memory_space<vmem>>, vector<1x4x128xf32>
    tpu.vector_store %arg11[%c0_65, %c0_66, %c0_67], %78 {strides = array<i32>} : memref<1x4x128xf32, #tpu.memory_space<vmem>>, vector<1x4x128xf32>,
    return
  }
  func.func @transform_0(%arg0: i32) -> (i32, i32, i32) {
    %c0_i32 = arith.constant 0 : i32
    %c0_i32_0 = arith.constant 0 : i32
    %c0_i32_1 = arith.constant 0 : i32
    return %arg0, %c0_i32, %c0_i32_0 : i32, i32, i32
  }
  func.func @transform_1(%arg0: i32) -> (i32, i32, i32, i32) {
    %c0_i32 = arith.constant 0 : i32
    %c0_i32_0 = arith.constant 0 : i32
    %c0_i32_1 = arith.constant 0 : i32
    %c0_i32_2 = arith.constant 0 : i32
    return %arg0, %c0_i32, %c0_i32_0, %c0_i32_1 : i32, i32, i32, i32
  }
  func.func @transform_2(%arg0: i32) -> (i32, i32, i32) {
    %c0_i32 = arith.constant 0 : i32
    %c0_i32_0 = arith.constant 0 : i32
    %c0_i32_1 = arith.constant 0 : i32
    return %arg0, %c0_i32, %c0_i32_0 : i32, i32, i32
  }
  func.func @transform_3(%arg0: i32) -> (i32, i32, i32) {
    %c0_i32 = arith.constant 0 : i32
    %c0_i32_0 = arith.constant 0 : i32
    %c0_i32_1 = arith.constant 0 : i32
    return %arg0, %c0_i32, %c0_i32_0 : i32, i32, i32
  }
  func.func @transform_4(%arg0: i32) -> (i32, i32, i32) {
    %c0_i32 = arith.constant 0 : i32
    %c0_i32_0 = arith.constant 0 : i32
    %c0_i32_1 = arith.constant 0 : i32
    %c0_i32_2 = arith.constant 0 : i32
    return %c0_i32, %c0_i32_0, %c0_i32_1 : i32, i32, i32
  }
  func.func @transform_5(%arg0: i32) -> (i32, i32, i32) {
    %c0_i32 = arith.constant 0 : i32
    %c0_i32_0 = arith.constant 0 : i32
    %c0_i32_1 = arith.constant 0 : i32
    %c0_i32_2 = arith.constant 0 : i32
    return %c0_i32, %c0_i32_0, %c0_i32_1 : i32, i32, i32
  }
  func.func @transform_6(%arg0: i32) -> (i32, i32, i32) {
    %c0_i32 = arith.constant 0 : i32
    %c0_i32_0 = arith.constant 0 : i32
    %c0_i32_1 = arith.constant 0 : i32
    %c0_i32_2 = arith.constant 0 : i32
    return %c0_i32, %c0_i32_0, %c0_i32_1 : i32, i32, i32
  }
  func.func @transform_7(%arg0: i32) -> (i32, i32, i32) {
    %c0_i32 = arith.constant 0 : i32
    %c0_i32_0 = arith.constant 0 : i32
    %c0_i32_1 = arith.constant 0 : i32
    %c0_i32_2 = arith.constant 0 : i32
    return %c0_i32, %c0_i32_0, %c0_i32_1 : i32, i32, i32
  }
  func.func @transform_8(%arg0: i32) -> (i32, i32) {
    %c0_i32 = arith.constant 0 : i32
    %c0_i32_0 = arith.constant 0 : i32
    %c0_i32_1 = arith.constant 0 : i32
    return %c0_i32, %c0_i32_0 : i32, i32
  }
  func.func @transform_9(%arg0: i32) -> (i32, i32) {
    %c0_i32 = arith.constant 0 : i32
    %c0_i32_0 = arith.constant 0 : i32
    %c0_i32_1 = arith.constant 0 : i32
    return %c0_i32, %c0_i32_0 : i32, i32
  }
  func.func @transform_10(%arg0: i32) -> (i32, i32, i32) {
    %c0_i32 = arith.constant 0 : i32
    %c0_i32_0 = arith.constant 0 : i32
    %c0_i32_1 = arith.constant 0 : i32
    return %arg0, %c0_i32, %c0_i32_0 : i32, i32, i32
  }
}

</mosaic_0001>

<bundles_post_ra>
// kernel: _forward_impl.1
= control target key start
LH: loop header
LB: loop body
LE: loop exit
PB: predicated region body
PF: predicated region fallthrough
CT: control target
= control target key end

     0   :  { %s1896_s13 = smov 0   ;;  %s2353_s0 = inlined_call_operand.vmem [shape: f32[4,128,32], index: 0, kind: input, shape index: {}]   ;;  %s2354_s1 = inlined_call_operand.vmem [shape: f32[4,3,128,32], index: 1, kind: input, shape index: {}]   ;;  %s2355_s2 = inlined_call_operand.vmem [shape: f32[4,128,128], index: 2, kind: input, shape index: {}]   ;;  %s2356_s3 = inlined_call_operand.vmem [shape: f32[4,4,128], index: 3, kind: input, shape index: {}]   ;;  %s2357_s4 = inlined_call_operand.vmem [shape: f32[3,32,64], index: 4, kind: input, shape index: {}]   ;;  %s2358_s5 = inlined_call_operand.vmem [shape: f32[3,1,64], index: 5, kind: input, shape index: {}]   ;;  %s2359_s6 = inlined_call_operand.vmem [shape: f32[3,64,32], index: 6, kind: input, shape index: {}]   ;;  %s2360_s7 = inlined_call_operand.vmem [shape: f32[3,1,32], index: 7, kind: input, shape index: {}]   ;;  %s2361_s8 = inlined_call_operand.vmem [shape: f32[32,128], index: 8, kind: input, shape index: {}]   ;;  %s2362_s9 = inlined_call_operand.vmem [shape: f32[1,128], index: 9, kind: input, shape index: {}]   ;;  %s2363_s10 = inlined_call_operand.vmem [shape: f32[4,4,128], index: 10, kind: output, shape index: {}]  }
   0x1 LB: > { %s1660_s14 = sadd.s32 4294967295, %s1839_s13   ;;  %p1664_p0 = scmp.ge.s32.totalorder %s1839_s13, 1  ;;  %s1839_s13 = sphi %s1896_s13, %s20_s13  }
   0x2   : > { %p341_p1 = scmp.lt.s32.totalorder %s1839_s13, 5 }
   0x4   : > { %p342_p2 = pnand %p1664_p0, %p341_p1 }
   0x5   : > { %p392_p3 = scmp.lt.s32.totalorder (!%p342_p2), %s1660_s14, 3 }
   0x6   : > { %345 = sbr.rel (%p342_p2) target bundleno = 1952 (0x7a0), region = 60 }
   0xb   : > { %s2365_s14 = smov (!%p392_p3, %s1660_s14), 3  ;;  %v563_v28 = vld [vmem:[%s2357_s4 + $0x18] sm:$0xff]  ;;  %v562_v29 = vld [vmem:[%s2357_s4 + $0x10] sm:$0xff]  ;;  %v561_v30 = vld [vmem:[%s2357_s4 + $0x8] sm:$0xff]  ;;  %vm568_vm0 = vcmask 261120   ;;  %vm710_vm1 = vcmask 523264  }
   0xc   : > { %s1799_s15 = sshll.u32 %s2365_s14, 7  ;;  %629 = vmatpush.msra.mxu1 %v563_v28  ;;  %1801 = vmatpush.msra.mxu2 %v563_v28  ;;  %v560_v32 = vld [vmem:[%s2357_s4] sm:$0xff]  ;;  %s1817_s30 = smul.u32 384, %s2365_s14 }
   0xd   : > { %s1912_s18 = scalar_lea.vmem %s2353_s0, %s1799_s15  ;;  %s1934_s21 = scalar_lea.vmem %s2355_s2, %s1799_s15  ;;  %1802 = vmatpush.msra.mxu3 %v563_v28 }
   0xe   : > { %v430_v0 = vld [vmem:[%s1912_s18 + $0x78] sm:$0xff]  ;;  %v429_v1 = vld [vmem:[%s1912_s18 + $0x70] sm:$0xff]  ;;  %v428_v2 = vld [vmem:[%s1912_s18 + $0x68] sm:$0xff]  ;;  %630 = vmatpush.msra.mxu1 %v562_v29  ;;  %1803 = vmatpush.msra.mxu2 %v562_v29  ;;  %s2016_s15 = scalar_lea.vmem %s2354_s1, %s1817_s30  ;;  %s1670_s11 = sshll.u32 %s2365_s14, 2 }
   0xf   : > { %495 = vmatpush.msra.mxu0 %v430_v0  ;;  %v427_v3 = vld [vmem:[%s1912_s18 + $0x60] sm:$0xff]  ;;  %v426_v4 = vld [vmem:[%s1912_s18 + $0x58] sm:$0xff]  ;;  %v425_v5 = vld [vmem:[%s1912_s18 + $0x50] sm:$0xff]  ;;  %1804 = vmatpush.msra.mxu3 %v562_v29  ;;  %s410_s17 = scalar_lea.vmem %s2356_s3, %s1670_s11 }
  0x10   : > { %v424_v6 = vld [vmem:[%s1912_s18 + $0x48] sm:$0xff]  ;;  %v423_v7 = vld [vmem:[%s1912_s18 + $0x40] sm:$0xff]  ;;  %v422_v8 = vld [vmem:[%s1912_s18 + $0x38] sm:$0xff]  ;;  %631 = vmatpush.msra.mxu1 %v561_v30  ;;  %1805 = vmatpush.msra.mxu2 %v561_v30 }
  0x11   : > { %496 = vmatpush.msra.mxu0 %v429_v1  ;;  %v421_v9 = vld [vmem:[%s1912_s18 + $0x30] sm:$0xff]  ;;  %v420_v10 = vld [vmem:[%s1912_s18 + $0x28] sm:$0xff]  ;;  %v419_v11 = vld [vmem:[%s1912_s18 + $0x20] sm:$0xff]  ;;  %1806 = vmatpush.msra.mxu3 %v561_v30 }
  0x12   : > { %v418_v12 = vld [vmem:[%s1912_s18 + $0x18] sm:$0xff]  ;;  %v417_v13 = vld [vmem:[%s1912_s18 + $0x10] sm:$0xff]  ;;  %v416_v14 = vld [vmem:[%s1912_s18 + $0x8] sm:$0xff]  ;;  %632 = vmatpush.msra.mxu1 %v560_v32  ;;  %1807 = vmatpush.msra.mxu2 %v560_v32 }
  0x13   : > { %497 = vmatpush.msra.mxu0 %v428_v2  ;;  %v415_v15 = vld [vmem:[%s1912_s18] sm:$0xff]  ;;  %v1942_v17 = vld [vmem:[%s1934_s21 + $0x8] sm:$0xff]  ;;  %v1946_v18 = vld [vmem:[%s1934_s21 + $0x10] sm:$0xff]  ;;  %1808 = vmatpush.msra.mxu3 %v560_v32 }
  0x14   : > { %v1938_v16 = vld [vmem:[%s1934_s21] sm:$0xff]  ;;  %v1950_v19 = vld [vmem:[%s1934_s21 + $0x18] sm:$0xff]  ;;  %v1958_v21 = vld [vmem:[%s1934_s21 + $0x28] sm:$0xff] }
  0x15   : > { %498 = vmatpush.msra.mxu0 %v427_v3  ;;  %v1954_v20 = vld [vmem:[%s1934_s21 + $0x20] sm:$0xff]  ;;  %v1962_v22 = vld [vmem:[%s1934_s21 + $0x30] sm:$0xff]  ;;  %v1966_v23 = vld [vmem:[%s1934_s21 + $0x38] sm:$0xff] }
  0x16   : > { %v1970_v24 = vld [vmem:[%s1934_s21 + $0x40] sm:$0xff]  ;;  %v1974_v25 = vld [vmem:[%s1934_s21 + $0x48] sm:$0xff]  ;;  %v1978_v26 = vld [vmem:[%s1934_s21 + $0x50] sm:$0xff] }
  0x17   : > { %499 = vmatpush.msra.mxu0 %v426_v4  ;;  %v1982_v27 = vld [vmem:[%s1934_s21 + $0x58] sm:$0xff]  ;;  %v1995_v31 = vld [vmem:[%s1934_s21 + $0x60] sm:$0xff]  ;;  %v2002_v33 = vld [vmem:[%s1934_s21 + $0x68] sm:$0xff] }
  0x18   : > { %v2006_v34 = vld [vmem:[%s1934_s21 + $0x70] sm:$0xff]  ;;  %v2011_v35 = vld [vmem:[%s1934_s21 + $0x78] sm:$0xff]  ;;  %v447_v36 = vld [vmem:[%s2016_s15] sm:$0xff]  ;;  %s414_s21 = scalar_lea.vmem %s2363_s10, %s1670_s11 }
  0x19   : > { %500 = vmatpush.msra.mxu0 %v425_v5  ;;  %v448_v39 = vld [vmem:[%s2016_s15 + $0x8] sm:$0xff]  ;;  %v449_v42 = vld [vmem:[%s2016_s15 + $0x10] sm:$0xff]  ;;  %v450_v45 = vld [vmem:[%s2016_s15 + $0x18] sm:$0xff] }
  0x1a   : > { %v451_v48 = vld [vmem:[%s2016_s15 + $0x20] sm:$0xff]  ;;  %v452_v51 = vld [vmem:[%s2016_s15 + $0x28] sm:$0xff]  ;;  %v453_v54 = vld [vmem:[%s2016_s15 + $0x30] sm:$0xff] }
  0x1b   : > { %501 = vmatpush.msra.mxu0 %v424_v6  ;;  %v454_v57 = vld [vmem:[%s2016_s15 + $0x38] sm:$0xff]  ;;  %v455_v60 = vld [vmem:[%s2016_s15 + $0x40] sm:$0xff]  ;;  %v456_v63 = vld [vmem:[%s2016_s15 + $0x48] sm:$0xff] }
  0x1c   : > { %v457_v2 = vld [vmem:[%s2016_s15 + $0x50] sm:$0xff]  ;;  %v705_v5 = vld [vmem:[%s2359_s6 + $0x38] sm:$0xff]  ;;  %v699_v29 = vld [vmem:[%s2359_s6 + $0x8] sm:$0xff] }
  0x1d   : > { %502 = vmatpush.msra.mxu0 %v423_v7  ;;  %767 = vmatpush.msrb.mxu2 %v705_v5  ;;  %v458_v6 = vld [vmem:[%s2016_s15 + $0x58] sm:$0xff]  ;;  %v704_v7 = vld [vmem:[%s2359_s6 + $0x30] sm:$0xff]  ;;  %v698_v30 = vld [vmem:[%s2359_s6] sm:$0xff] }
  0x1e   : > { %v460_v32 = vld [vmem:[%s2016_s15 + $0x68] sm:$0xff] }
  0x1f   : > { %503 = vmatpush.msra.mxu0 %v422_v8  ;;  %768 = vmatpush.msrb.mxu2 %v704_v7 }
  0x21   : > { %504 = vmatpush.msra.mxu0 %v421_v9 }
  0x23   : > { %505 = vmatpush.msra.mxu0 %v420_v10  ;;  %v703_v10 = vld [vmem:[%s2359_s6 + $0x28] sm:$0xff] }
  0x24   : > { %769 = vmatpush.msrb.mxu2 %v703_v10 }
  0x25   : > { %506 = vmatpush.msra.mxu0 %v419_v11  ;;  %v702_v11 = vld [vmem:[%s2359_s6 + $0x20] sm:$0xff] }
  0x26   : > { %770 = vmatpush.msrb.mxu2 %v702_v11 }
  0x27   : > { %507 = vmatpush.msra.mxu0 %v418_v12  ;;  %v701_v12 = vld [vmem:[%s2359_s6 + $0x18] sm:$0xff] }
  0x28   : > { %771 = vmatpush.msrb.mxu2 %v701_v12 }
  0x29   : > { %508 = vmatpush.msra.mxu0 %v417_v13  ;;  %v459_v13 = vld [vmem:[%s2016_s15 + $0x60] sm:$0xff] }
  0x2b   : > { %509 = vmatpush.msra.mxu0 %v416_v14  ;;  %v700_v14 = vld [vmem:[%s2359_s6 + $0x10] sm:$0xff] }
  0x2c   : > { %772 = vmatpush.msrb.mxu2 %v700_v14 }
  0x2d   : > { %510 = vmatpush.msra.mxu0 %v415_v15 }
  0x2e   : > { %511 = vmatmul.f32.vlgmr.msra.gmra.mxu0 %v1938_v16  ;;  %773 = vmatpush.msrb.mxu2 %v699_v29 }
  0x30   : > { %774 = vmatpush.msrb.mxu2 %v698_v30 }
  0x36   : > { %514 = vmatmul.f32.gmra.mxu0 %v1942_v17 }
  0x3e   : > { %517 = vmatmul.f32.gmra.mxu0 %v1946_v18 }
  0x46   : > { %520 = vmatmul.f32.gmra.mxu0 %v1950_v19 }
  0x4e   : > { %523 = vmatmul.f32.gmra.mxu0 %v1954_v20 }
  0x56   : > { %526 = vmatmul.f32.gmra.mxu0 %v1958_v21 }
  0x5e   : > { %529 = vmatmul.f32.gmra.mxu0 %v1962_v22 }
  0x66   : > { %532 = vmatmul.f32.gmra.mxu0 %v1966_v23 }
  0x6e   : > { %535 = vmatmul.f32.gmra.mxu0 %v1970_v24 }
  0x76   : > { %538 = vmatmul.f32.gmra.mxu0 %v1974_v25 }
  0x7e   : > { %541 = vmatmul.f32.gmra.mxu0 %v1978_v26 }
  0x86   : > { %544 = vmatmul.f32.gmra.mxu0 %v1982_v27 }
  0x8e   : > { %547 = vmatmul.f32.gmra.mxu0 %v1995_v31 }
  0x96   : > { %550 = vmatmul.f32.gmra.mxu0 %v2002_v33 }
  0x9e   : > { %553 = vmatmul.f32.gmra.mxu0 %v2006_v34 }
  0xa6   : > { %556 = vmatmul.f32.gmra.mxu0 %v2011_v35 }
  0xab   : > { %v512_v37 = vpop.f32.mrf.mxu0 }
  0xac   : > { %v513_v38 = vadd.f32 %v512_v37, %v447_v36 }
  0xae   : > { %1672 = vmatmul.msk.f32.vlgmr.msra.gmra.mxu1 %vm568_vm0, %v513_v38  ;;  %v461_v38 = vld [vmem:[%s2016_s15 + $0x70] sm:$0xff] }
  0xb3   : > { %v515_v40 = vpop.f32.mrf.mxu0 }
  0xb4   : > { %v516_v41 = vadd.f32 %v515_v40, %v448_v39 }
  0xb6   : > { %1673 = vmatmul.msk.f32.gmra.mxu1 %vm568_vm0, %v516_v41  ;;  %v462_v41 = vld [vmem:[%s2016_s15 + $0x78] sm:$0xff] }
  0xbb   : > { %v518_v43 = vpop.f32.mrf.mxu0 }
  0xbc   : > { %v519_v44 = vadd.f32 %v518_v43, %v449_v42 }
  0xbe   : > { %1674 = vmatmul.msk.f32.gmra.mxu1 %vm568_vm0, %v519_v44  ;;  %v2078_v44 = vld [vmem:[%s2358_s5] ss:$0 sm:$0xff] }
  0xc3   : > { %v521_v46 = vpop.f32.mrf.mxu0 }
  0xc4   : > { %v522_v47 = vadd.f32 %v521_v46, %v450_v45 }
  0xc6   : > { %1675 = vmatmul.msk.f32.gmra.mxu1 %vm568_vm0, %v522_v47 }
  0xcb   : > { %v524_v49 = vpop.f32.mrf.mxu0 }
  0xcc   : > { %v525_v50 = vadd.f32 %v524_v49, %v451_v48 }
  0xce   : > { %1676 = vmatmul.msk.f32.gmra.mxu1 %vm568_vm0, %v525_v50 }
  0xd3   : > { %v527_v52 = vpop.f32.mrf.mxu0 }
  0xd4   : > { %v528_v53 = vadd.f32 %v527_v52, %v452_v51 }
  0xd6   : > { %1677 = vmatmul.msk.f32.gmra.mxu1 %vm568_vm0, %v528_v53 }
  0xdb   : > { %v530_v55 = vpop.f32.mrf.mxu0 }
  0xdc   : > { %v531_v56 = vadd.f32 %v530_v55, %v453_v54 }
  0xde   : > { %1678 = vmatmul.msk.f32.gmra.mxu1 %vm568_vm0, %v531_v56 }
  0xe3   : > { %v533_v58 = vpop.f32.mrf.mxu0 }
  0xe4   : > { %v534_v59 = vadd.f32 %v533_v58, %v454_v57 }
  0xe6   : > { %1679 = vmatmul.msk.f32.vlgmr.msra.gmra.mxu2 %vm568_vm0, %v534_v59 }
  0xeb   : > { %v536_v61 = vpop.f32.mrf.mxu0 }
  0xec   : > { %v537_v62 = vadd.f32 %v536_v61, %v455_v60 }
  0xee   : > { %1680 = vmatmul.msk.f32.gmra.mxu2 %vm568_vm0, %v537_v62 }
  0xf3   : > { %v539_v0 = vpop.f32.mrf.mxu0 }
  0xf4   : > { %v540_v1 = vadd.f32 %v539_v0, %v456_v63 }
  0xf6   : > { %1681 = vmatmul.msk.f32.gmra.mxu2 %vm568_vm0, %v540_v1 }
  0xfb   : > { %v542_v3 = vpop.f32.mrf.mxu0 }
  0xfc   : > { %v543_v4 = vadd.f32 %v542_v3, %v457_v2 }
  0xfe   : > { %1682 = vmatmul.msk.f32.gmra.mxu2 %vm568_vm0, %v543_v4 }
 0x103   : > { %v545_v8 = vpop.f32.mrf.mxu0 }
 0x104   : > { %v546_v9 = vadd.f32 %v545_v8, %v458_v6 }
 0x106   : > { %1683 = vmatmul.msk.f32.gmra.mxu2 %vm568_vm0, %v546_v9 }
 0x10b   : > { %v548_v15 = vpop.f32.mrf.mxu0 }
 0x10c   : > { %v549_v28 = vadd.f32 %v548_v15, %v459_v13 }
 0x10e   : > { %1684 = vmatmul.msk.f32.vlgmr.msra.gmra.mxu3 %vm568_vm0, %v549_v28 }
 0x113   : > { %v551_v36 = vpop.f32.mrf.mxu0 }
 0x114   : > { %v552_v37 = vadd.f32 %v551_v36, %v460_v32 }
 0x116   : > { %1685 = vmatmul.msk.f32.gmra.mxu3 %vm568_vm0, %v552_v37 }
 0x11b   : > { %v554_v39 = vpop.f32.mrf.mxu0 }
 0x11c   : > { %v555_v40 = vadd.f32 %v554_v39, %v461_v38 }
 0x11e   : > { %1686 = vmatmul.msk.f32.gmra.mxu3 %vm568_vm0, %v555_v40 }
 0x123   : > { %v557_v42 = vpop.f32.mrf.mxu0 }
 0x124   : > { %v558_v43 = vadd.f32 %v557_v42, %v462_v41 }
 0x126   : > { %1687 = vmatmul.msk.f32.gmra.mxu3 %vm568_vm0, %v558_v43 }
 0x12b   : > { %v634_v45 = vpop.f32.mrf.mxu1 }
 0x12c   : > { %v635_v46 = vadd.f32 %v2078_v44, %v634_v45 }
 0x12e   : > { %v682_v47 = vmax.f32 %v635_v46, 0.0 }
 0x130   : > { %1688 = vmatmul.msk.f32.vlgmr.msrb.gmra.mxu2 %vm710_vm1, %v682_v47 }
 0x133   : > { %v637_v48 = vpop.f32.mrf.mxu1 }
 0x134   : > { %v638_v49 = vadd.f32 %v2078_v44, %v637_v48 }
 0x136   : > { %v683_v50 = vmax.f32 %v638_v49, 0.0 }
 0x138   : > { %1689 = vmatmul.msk.f32.gmra.mxu2 %vm710_vm1, %v683_v50 }
 0x13b   : > { %v640_v51 = vpop.f32.mrf.mxu1 }
 0x13c   : > { %v641_v52 = vadd.f32 %v2078_v44, %v640_v51 }
 0x13e   : > { %v684_v53 = vmax.f32 %v641_v52, 0.0 }
 0x140   : > { %1690 = vmatmul.msk.f32.gmra.mxu2 %vm710_vm1, %v684_v53 }
 0x143   : > { %v643_v54 = vpop.f32.mrf.mxu1 }
 0x144   : > { %v644_v55 = vadd.f32 %v2078_v44, %v643_v54 }
 0x146   : > { %v685_v56 = vmax.f32 %v644_v55, 0.0 }
 0x148   : > { %1691 = vmatmul.msk.f32.gmra.mxu2 %vm710_vm1, %v685_v56 }
 0x14b   : > { %v646_v57 = vpop.f32.mrf.mxu1 }
 0x14c   : > { %v647_v58 = vadd.f32 %v2078_v44, %v646_v57 }
 0x14e   : > { %v686_v59 = vmax.f32 %v647_v58, 0.0 }
 0x150   : > { %1692 = vmatmul.msk.f32.gmra.mxu2 %vm710_vm1, %v686_v59 }
 0x153   : > { %v649_v60 = vpop.f32.mrf.mxu1 }
 0x154   : > { %v650_v61 = vadd.f32 %v2078_v44, %v649_v60 }
 0x156   : > { %v687_v62 = vmax.f32 %v650_v61, 0.0 }
 0x158   : > { %1693 = vmatmul.msk.f32.gmra.mxu2 %vm710_vm1, %v687_v62 }
 0x15b   : > { %v652_v63 = vpop.f32.mrf.mxu1 }
 0x15c   : > { %v653_v0 = vadd.f32 %v2078_v44, %v652_v63 }
 0x15e   : > { %v688_v1 = vmax.f32 %v653_v0, 0.0 }
 0x160   : > { %1694 = vmatmul.msk.f32.gmra.mxu2 %vm710_vm1, %v688_v1 }
 0x169   : > { %v655_v2 = vpop.f32.mrf.mxu2 }
 0x16a   : > { %v656_v3 = vadd.f32 %v2078_v44, %v655_v2 }
 0x16c   : > { %v689_v4 = vmax.f32 %v656_v3, 0.0 }
 0x16e   : > { %1695 = vmatmul.msk.f32.gmra.mxu2 %vm710_vm1, %v689_v4 }
 0x171   : > { %v658_v5 = vpop.f32.mrf.mxu2 }
 0x172   : > { %v659_v6 = vadd.f32 %v2078_v44, %v658_v5 }
 0x174   : > { %v690_v7 = vmax.f32 %v659_v6, 0.0 }
 0x176   : > { %1696 = vmatmul.msk.f32.gmra.mxu2 %vm710_vm1, %v690_v7 }
 0x179   : > { %v661_v8 = vpop.f32.mrf.mxu2 }
 0x17a   : > { %v662_v9 = vadd.f32 %v2078_v44, %v661_v8 }
 0x17c   : > { %v691_v10 = vmax.f32 %v662_v9, 0.0 }
 0x17e   : > { %1697 = vmatmul.msk.f32.gmra.mxu2 %vm710_vm1, %v691_v10 }
 0x181   : > { %v664_v11 = vpop.f32.mrf.mxu2 }
 0x182   : > { %v665_v12 = vadd.f32 %v2078_v44, %v664_v11 }
 0x184   : > { %v692_v13 = vmax.f32 %v665_v12, 0.0 }
 0x186   : > { %1698 = vmatmul.msk.f32.gmra.mxu2 %vm710_vm1, %v692_v13 }
 0x189   : > { %v667_v14 = vpop.f32.mrf.mxu2 }
 0x18a   : > { %v668_v15 = vadd.f32 %v2078_v44, %v667_v14 }
 0x18c   : > { %v693_v28 = vmax.f32 %v668_v15, 0.0 }
 0x18e   : > { %1699 = vmatmul.msk.f32.gmra.mxu2 %vm710_vm1, %v693_v28 }
 0x191   : > { %v670_v29 = vpop.f32.mrf.mxu3 }
 0x192   : > { %v671_v30 = vadd.f32 %v2078_v44, %v670_v29 }
 0x194   : > { %v694_v32 = vmax.f32 %v671_v30, 0.0 }
 0x196   : > { %1700 = vmatmul.msk.f32.gmra.mxu2 %vm710_vm1, %v694_v32 }
 0x199   : > { %v673_v36 = vpop.f32.mrf.mxu3 }
 0x19a   : > { %v674_v37 = vadd.f32 %v2078_v44, %v673_v36 }
 0x19c   : > { %v695_v38 = vmax.f32 %v674_v37, 0.0 }
 0x19e   : > { %1701 = vmatmul.msk.f32.gmra.mxu2 %vm710_vm1, %v695_v38 }
 0x1a1   : > { %v676_v39 = vpop.f32.mrf.mxu3 }
 0x1a2   : > { %v677_v40 = vadd.f32 %v2078_v44, %v676_v39 }
 0x1a4   : > { %v696_v41 = vmax.f32 %v677_v40, 0.0 }
 0x1a6   : > { %1702 = vmatmul.msk.f32.gmra.mxu2 %vm710_vm1, %v696_v41 }
 0x1a9   : > { %v679_v42 = vpop.f32.mrf.mxu3 }
 0x1aa   : > { %v680_v43 = vadd.f32 %v2078_v44, %v679_v42  ;;  %v1827_v44 = vld [vmem:[%s2360_s7] ss:$0 sm:$0xff] }
 0x1ac   : > { %v697_v45 = vmax.f32 %v680_v43, 0.0 }
 0x1ae   : > { %1703 = vmatmul.msk.f32.gmra.mxu2 %vm710_vm1, %v697_v45 }
 0x1b3   : > { %v776_v46 = vpop.f32.mrf.mxu2 }
 0x1b4   : > { %v777_v42 = vadd.f32 %v1827_v44, %v776_v46  ;;  %v1707_v46 = vld [vmem:[%s2357_s4 + $0x38] sm:$0xff] }
 0x1b5   : > { %975 = vmatpush.msrb.mxu1 %v1707_v46 }
 0x1bb   : > { %v779_v47 = vpop.f32.mrf.mxu2 }
 0x1bc   : > { %v780_v40 = vadd.f32 %v1827_v44, %v779_v47  ;;  %v1706_v47 = vld [vmem:[%s2357_s4 + $0x30] sm:$0xff] }
 0x1bd   : > { %976 = vmatpush.msrb.mxu1 %v1706_v47  ;;  %v1726_v47 = vld [vmem:[%s2359_s6 + $0x48] sm:$0xff] }
 0x1be   : > { %v825_v45 = vmax.f32 %v780_v40, 0.0  ;;  %v1730_v40 = vld [vmem:[%s2359_s6 + $0x68] sm:$0xff] }
 0x1c3   : > { %v782_v48 = vpop.f32.mrf.mxu2 }
 0x1c4   : > { %v783_v38 = vadd.f32 %v1827_v44, %v782_v48  ;;  %v1705_v48 = vld [vmem:[%s2357_s4 + $0x28] sm:$0xff] }
 0x1c5   : > { %977 = vmatpush.msrb.mxu1 %v1705_v48  ;;  %v1725_v48 = vld [vmem:[%s2359_s6 + $0x40] sm:$0xff] }
 0x1c6   : > { %v826_v43 = vmax.f32 %v783_v38, 0.0 }
 0x1cb   : > { %v785_v49 = vpop.f32.mrf.mxu2 }
 0x1cc   : > { %v786_v36 = vadd.f32 %v1827_v44, %v785_v49  ;;  %v1704_v49 = vld [vmem:[%s2357_s4 + $0x20] sm:$0xff] }
 0x1cd   : > { %978 = vmatpush.msrb.mxu1 %v1704_v49  ;;  %v476_v49 = vld [vmem:[%s2016_s15 + $0xe8] sm:$0xff] }
 0x1ce   : > { %v827_v41 = vmax.f32 %v786_v36, 0.0  ;;  %v1731_v36 = vld [vmem:[%s2359_s6 + $0x70] sm:$0xff] }
 0x1d3   : > { %v788_v50 = vpop.f32.mrf.mxu2 }
 0x1d4   : > { %v789_v30 = vadd.f32 %v1827_v44, %v788_v50  ;;  %v463_v50 = vld [vmem:[%s2016_s15 + $0x80] sm:$0xff] }
 0x1d6   : > { %v828_v39 = vmax.f32 %v789_v30, 0.0 }
 0x1db   : > { %v791_v51 = vpop.f32.mrf.mxu2 }
 0x1dc   : > { %v792_v28 = vadd.f32 %v1827_v44, %v791_v51  ;;  %v824_v51 = vmax.f32 %v777_v42, 0.0  ;;  %v1728_v42 = vld [vmem:[%s2359_s6 + $0x58] sm:$0xff] }
 0x1de   : > { %v829_v37 = vmax.f32 %v792_v28, 0.0 }
 0x1e3   : > { %v794_v52 = vpop.f32.mrf.mxu2 }
 0x1e4   : > { %v795_v14 = vadd.f32 %v1827_v44, %v794_v52 }
 0x1e6   : > { %v830_v32 = vmax.f32 %v795_v14, 0.0  ;;  %v472_v14 = vld [vmem:[%s2016_s15 + $0xc8] sm:$0xff] }
 0x1f1   : > { %v797_v53 = vpop.f32.mrf.mxu2 }
 0x1f2   : > { %v798_v12 = vadd.f32 %v1827_v44, %v797_v53 }
 0x1f4   : > { %v831_v29 = vmax.f32 %v798_v12, 0.0 }
 0x1f9   : > { %v800_v54 = vpop.f32.mrf.mxu2 }
 0x1fa   : > { %v801_v10 = vadd.f32 %v1827_v44, %v800_v54  ;;  %v464_v54 = vld [vmem:[%s2016_s15 + $0x88] sm:$0xff] }
 0x1fc   : > { %v832_v15 = vmax.f32 %v801_v10, 0.0  ;;  %v471_v10 = vld [vmem:[%s2016_s15 + $0xc0] sm:$0xff] }
 0x201   : > { %v803_v55 = vpop.f32.mrf.mxu2 }
 0x202   : > { %v804_v8 = vadd.f32 %v1827_v44, %v803_v55 }
 0x204   : > { %v833_v13 = vmax.f32 %v804_v8, 0.0 }
 0x209   : > { %v806_v56 = vpop.f32.mrf.mxu2 }
 0x20a   : > { %v807_v6 = vadd.f32 %v1827_v44, %v806_v56 }
 0x20c   : > { %v834_v11 = vmax.f32 %v807_v6, 0.0 }
 0x211   : > { %v809_v57 = vpop.f32.mrf.mxu2 }
 0x212   : > { %v810_v4 = vadd.f32 %v1827_v44, %v809_v57  ;;  %v465_v57 = vld [vmem:[%s2016_s15 + $0x90] sm:$0xff] }
 0x214   : > { %v835_v9 = vmax.f32 %v810_v4, 0.0  ;;  %v469_v4 = vld [vmem:[%s2016_s15 + $0xb0] sm:$0xff] }
 0x219   : > { %v812_v58 = vpop.f32.mrf.mxu2 }
 0x21a   : > { %v813_v2 = vadd.f32 %v1827_v44, %v812_v58 }
 0x21c   : > { %v836_v7 = vmax.f32 %v813_v2, 0.0 }
 0x221   : > { %v815_v59 = vpop.f32.mrf.mxu2 }
 0x222   : > { %v816_v0 = vadd.f32 %v1827_v44, %v815_v59 }
 0x224   : > { %v837_v5 = vmax.f32 %v816_v0, 0.0 }
 0x229   : > { %v818_v60 = vpop.f32.mrf.mxu2 }
 0x22a   : > { %v819_v62 = vadd.f32 %v1827_v44, %v818_v60  ;;  %v466_v60 = vld [vmem:[%s2016_s15 + $0x98] sm:$0xff] }
 0x22c   : > { %v838_v3 = vmax.f32 %v819_v62, 0.0  ;;  %v467_v62 = vld [vmem:[%s2016_s15 + $0xa0] sm:$0xff] }
 0x231   : > { %v821_v61 = vpop.f32.mrf.mxu2 }
 0x232   : > { %v822_v63 = vadd.f32 %v1827_v44, %v821_v61 }
 0x234   : > { %v839_v1 = vmax.f32 %v822_v63, 0.0 }
 0x236   : > { %840 = vmatpush.msrb.mxu3 %v839_v1  ;;  %v468_v1 = vld [vmem:[%s2016_s15 + $0xa8] sm:$0xff] }
 0x238   : > { %841 = vmatpush.msrb.mxu3 %v838_v3 }
 0x23a   : > { %842 = vmatpush.msrb.mxu3 %v837_v5 }
 0x23c   : > { %843 = vmatpush.msrb.mxu3 %v836_v7  ;;  %v470_v7 = vld [vmem:[%s2016_s15 + $0xb8] sm:$0xff] }
 0x23e   : > { %844 = vmatpush.msrb.mxu3 %v835_v9 }
 0x240   : > { %845 = vmatpush.msrb.mxu3 %v834_v11 }
 0x242   : > { %846 = vmatpush.msrb.mxu3 %v833_v13  ;;  %v1732_v13 = vld [vmem:[%s2359_s6 + $0x78] sm:$0xff] }
 0x243   : > { %1114 = vmatpush.msra.mxu2 %v1732_v13 }
 0x244   : > { %847 = vmatpush.msrb.mxu3 %v832_v15 }
 0x245   : > { %1115 = vmatpush.msra.mxu2 %v1731_v36 }
 0x246   : > { %848 = vmatpush.msrb.mxu3 %v831_v29  ;;  %v473_v29 = vld [vmem:[%s2016_s15 + $0xd0] sm:$0xff] }
 0x247   : > { %1116 = vmatpush.msra.mxu2 %v1730_v40 }
 0x248   : > { %849 = vmatpush.msrb.mxu3 %v830_v32 }
 0x24a   : > { %850 = vmatpush.msrb.mxu3 %v829_v37  ;;  %v474_v37 = vld [vmem:[%s2016_s15 + $0xd8] sm:$0xff] }
 0x24c   : > { %851 = vmatpush.msrb.mxu3 %v828_v39 }
 0x24e   : > { %852 = vmatpush.msrb.mxu3 %v827_v41  ;;  %v1729_v41 = vld [vmem:[%s2359_s6 + $0x60] sm:$0xff] }
 0x24f   : > { %1117 = vmatpush.msra.mxu2 %v1729_v41 }
 0x250   : > { %853 = vmatpush.msrb.mxu3 %v826_v43  ;;  %v475_v43 = vld [vmem:[%s2016_s15 + $0xe0] sm:$0xff] }
 0x251   : > { %1118 = vmatpush.msra.mxu2 %v1728_v42 }
 0x252   : > { %854 = vmatpush.msrb.mxu3 %v825_v45  ;;  %v1727_v45 = vld [vmem:[%s2359_s6 + $0x50] sm:$0xff] }
 0x253   : > { %1119 = vmatpush.msra.mxu2 %v1727_v45 }
 0x254   : > { %855 = vmatpush.msrb.mxu3 %v824_v51 }
 0x255   : > { %856 = vmatmul.f32.vlgmr.msrb.gmra.mxu3 %v1938_v16  ;;  %1120 = vmatpush.msra.mxu2 %v1726_v47 }
 0x257   : > { %1121 = vmatpush.msra.mxu2 %v1725_v48 }
 0x25d   : > { %859 = vmatmul.f32.gmra.mxu3 %v1942_v17 }
 0x265   : > { %862 = vmatmul.f32.gmra.mxu3 %v1946_v18 }
 0x26d   : > { %865 = vmatmul.f32.gmra.mxu3 %v1950_v19 }
 0x275   : > { %868 = vmatmul.f32.gmra.mxu3 %v1954_v20 }
 0x27d   : > { %871 = vmatmul.f32.gmra.mxu3 %v1958_v21 }
 0x285   : > { %874 = vmatmul.f32.gmra.mxu3 %v1962_v22 }
 0x28d   : > { %877 = vmatmul.f32.gmra.mxu3 %v1966_v23 }
 0x295   : > { %880 = vmatmul.f32.gmra.mxu3 %v1970_v24 }
 0x29d   : > { %883 = vmatmul.f32.gmra.mxu3 %v1974_v25 }
 0x2a5   : > { %886 = vmatmul.f32.gmra.mxu3 %v1978_v26 }
 0x2ad   : > { %889 = vmatmul.f32.gmra.mxu3 %v1982_v27 }
 0x2b5   : > { %892 = vmatmul.f32.gmra.mxu3 %v1995_v31 }
 0x2bd   : > { %895 = vmatmul.f32.gmra.mxu3 %v2002_v33 }
 0x2c5   : > { %898 = vmatmul.f32.gmra.mxu3 %v2006_v34 }
 0x2cd   : > { %901 = vmatmul.f32.gmra.mxu3 %v2011_v35 }
 0x2d8   : > { %v857_v52 = vpop.f32.mrf.mxu3 }
 0x2d9   : > { %v858_v53 = vadd.f32 %v857_v52, %v463_v50 }
 0x2db   : > { %1709 = vmatmul.msk.f32.vlgmr.msrb.gmra.mxu1 %vm568_vm0, %v858_v53  ;;  %v477_v53 = vld [vmem:[%s2016_s15 + $0xf0] sm:$0xff] }
 0x2e0   : > { %v860_v55 = vpop.f32.mrf.mxu3 }
 0x2e1   : > { %v861_v56 = vadd.f32 %v860_v55, %v464_v54 }
 0x2e3   : > { %1710 = vmatmul.msk.f32.gmra.mxu1 %vm568_vm0, %v861_v56  ;;  %v478_v56 = vld [vmem:[%s2016_s15 + $0xf8] sm:$0xff] }
 0x2e8   : > { %v863_v58 = vpop.f32.mrf.mxu3 }
 0x2e9   : > { %v864_v59 = vadd.f32 %v863_v58, %v465_v57 }
 0x2eb   : > { %1711 = vmatmul.msk.f32.gmra.mxu1 %vm568_vm0, %v864_v59  ;;  %v1828_v59 = vld [vmem:[%s2358_s5 + $0x1] ss:$0 sm:$0xff] }
 0x2f0   : > { %v866_v44 = vpop.f32.mrf.mxu3 }
 0x2f1   : > { %v867_v61 = vadd.f32 %v866_v44, %v466_v60 }
 0x2f3   : > { %1712 = vmatmul.msk.f32.gmra.mxu1 %vm568_vm0, %v867_v61 }
 0x2f8   : > { %v869_v63 = vpop.f32.mrf.mxu3 }
 0x2f9   : > { %v870_v0 = vadd.f32 %v869_v63, %v467_v62 }
 0x2fb   : > { %1713 = vmatmul.msk.f32.gmra.mxu1 %vm568_vm0, %v870_v0 }
 0x300   : > { %v872_v2 = vpop.f32.mrf.mxu3 }
 0x301   : > { %v873_v3 = vadd.f32 %v872_v2, %v468_v1 }
 0x303   : > { %1714 = vmatmul.msk.f32.gmra.mxu1 %vm568_vm0, %v873_v3 }
 0x308   : > { %v875_v5 = vpop.f32.mrf.mxu3 }
 0x309   : > { %v876_v6 = vadd.f32 %v875_v5, %v469_v4 }
 0x30b   : > { %1715 = vmatmul.msk.f32.gmra.mxu1 %vm568_vm0, %v876_v6 }
 0x310   : > { %v878_v8 = vpop.f32.mrf.mxu3 }
 0x311   : > { %v879_v9 = vadd.f32 %v878_v8, %v470_v7 }
 0x313   : > { %1716 = vmatmul.msk.f32.gmra.mxu1 %vm568_vm0, %v879_v9 }
 0x318   : > { %v881_v11 = vpop.f32.mrf.mxu3 }
 0x319   : > { %v882_v12 = vadd.f32 %v881_v11, %v471_v10 }
 0x31b   : > { %1717 = vmatmul.msk.f32.gmra.mxu1 %vm568_vm0, %v882_v12 }
 0x320   : > { %v884_v15 = vpop.f32.mrf.mxu3 }
 0x321   : > { %v885_v28 = vadd.f32 %v884_v15, %v472_v14 }
 0x323   : > { %1718 = vmatmul.msk.f32.gmra.mxu1 %vm568_vm0, %v885_v28 }
 0x328   : > { %v887_v30 = vpop.f32.mrf.mxu3 }
 0x329   : > { %v888_v32 = vadd.f32 %v887_v30, %v473_v29 }
 0x32b   : > { %1719 = vmatmul.msk.f32.gmra.mxu1 %vm568_vm0, %v888_v32 }
 0x330   : > { %v890_v38 = vpop.f32.mrf.mxu3 }
 0x331   : > { %v891_v39 = vadd.f32 %v890_v38, %v474_v37 }
 0x333   : > { %1720 = vmatmul.msk.f32.gmra.mxu1 %vm568_vm0, %v891_v39 }
 0x338   : > { %v893_v51 = vpop.f32.mrf.mxu3 }
 0x339   : > { %v894_v46 = vadd.f32 %v893_v51, %v475_v43 }
 0x33b   : > { %1721 = vmatmul.msk.f32.gmra.mxu1 %vm568_vm0, %v894_v46 }
 0x340   : > { %v896_v50 = vpop.f32.mrf.mxu3 }
 0x341   : > { %v897_v52 = vadd.f32 %v896_v50, %v476_v49 }
 0x343   : > { %1722 = vmatmul.msk.f32.gmra.mxu1 %vm568_vm0, %v897_v52 }
 0x348   : > { %v899_v54 = vpop.f32.mrf.mxu3 }
 0x349   : > { %v900_v55 = vadd.f32 %v899_v54, %v477_v53 }
 0x34b   : > { %1723 = vmatmul.msk.f32.gmra.mxu1 %vm568_vm0, %v900_v55 }
 0x350   : > { %v902_v57 = vpop.f32.mrf.mxu3 }
 0x351   : > { %v903_v58 = vadd.f32 %v902_v57, %v478_v56 }
 0x353   : > { %1724 = vmatmul.msk.f32.gmra.mxu1 %vm568_vm0, %v903_v58 }
 0x358   : > { %v980_v60 = vpop.f32.mrf.mxu1 }
 0x359   : > { %v981_v44 = vadd.f32 %v1828_v59, %v980_v60 }
 0x35b   : > { %v1028_v61 = vmax.f32 %v981_v44, 0.0 }
 0x35d   : > { %1734 = vmatmul.msk.f32.vlgmr.msra.gmra.mxu2 %vm710_vm1, %v1028_v61 }
 0x360   : > { %v983_v62 = vpop.f32.mrf.mxu1 }
 0x361   : > { %v984_v63 = vadd.f32 %v1828_v59, %v983_v62 }
 0x363   : > { %v1029_v0 = vmax.f32 %v984_v63, 0.0 }
 0x365   : > { %1735 = vmatmul.msk.f32.gmra.mxu2 %vm710_vm1, %v1029_v0 }
 0x368   : > { %v986_v1 = vpop.f32.mrf.mxu1 }
 0x369   : > { %v987_v2 = vadd.f32 %v1828_v59, %v986_v1 }
 0x36b   : > { %v1030_v3 = vmax.f32 %v987_v2, 0.0 }
 0x36d   : > { %1736 = vmatmul.msk.f32.gmra.mxu2 %vm710_vm1, %v1030_v3 }
 0x370   : > { %v989_v4 = vpop.f32.mrf.mxu1 }
 0x371   : > { %v990_v5 = vadd.f32 %v1828_v59, %v989_v4 }
 0x373   : > { %v1031_v6 = vmax.f32 %v990_v5, 0.0 }
 0x375   : > { %1737 = vmatmul.msk.f32.gmra.mxu2 %vm710_vm1, %v1031_v6 }
 0x378   : > { %v992_v7 = vpop.f32.mrf.mxu1 }
 0x379   : > { %v993_v8 = vadd.f32 %v1828_v59, %v992_v7 }
 0x37b   : > { %v1032_v9 = vmax.f32 %v993_v8, 0.0 }
 0x37d   : > { %1738 = vmatmul.msk.f32.gmra.mxu2 %vm710_vm1, %v1032_v9 }
 0x380   : > { %v995_v10 = vpop.f32.mrf.mxu1 }
 0x381   : > { %v996_v11 = vadd.f32 %v1828_v59, %v995_v10 }
 0x383   : > { %v1033_v12 = vmax.f32 %v996_v11, 0.0 }
 0x385   : > { %1739 = vmatmul.msk.f32.gmra.mxu2 %vm710_vm1, %v1033_v12 }
 0x388   : > { %v998_v13 = vpop.f32.mrf.mxu1 }
 0x389   : > { %v999_v14 = vadd.f32 %v1828_v59, %v998_v13 }
 0x38b   : > { %v1034_v15 = vmax.f32 %v999_v14, 0.0 }
 0x38d   : > { %1740 = vmatmul.msk.f32.gmra.mxu2 %vm710_vm1, %v1034_v15 }
 0x390   : > { %v1001_v28 = vpop.f32.mrf.mxu1 }
 0x391   : > { %v1002_v29 = vadd.f32 %v1828_v59, %v1001_v28 }
 0x393   : > { %v1035_v30 = vmax.f32 %v1002_v29, 0.0 }
 0x395   : > { %1741 = vmatmul.msk.f32.gmra.mxu2 %vm710_vm1, %v1035_v30 }
 0x398   : > { %v1004_v32 = vpop.f32.mrf.mxu1 }
 0x399   : > { %v1005_v36 = vadd.f32 %v1828_v59, %v1004_v32 }
 0x39b   : > { %v1036_v37 = vmax.f32 %v1005_v36, 0.0 }
 0x39d   : > { %1742 = vmatmul.msk.f32.gmra.mxu2 %vm710_vm1, %v1036_v37 }
 0x3a0   : > { %v1007_v38 = vpop.f32.mrf.mxu1 }
 0x3a1   : > { %v1008_v39 = vadd.f32 %v1828_v59, %v1007_v38 }
 0x3a3   : > { %v1037_v40 = vmax.f32 %v1008_v39, 0.0 }
 0x3a5   : > { %1743 = vmatmul.msk.f32.gmra.mxu2 %vm710_vm1, %v1037_v40 }
 0x3a8   : > { %v1010_v41 = vpop.f32.mrf.mxu1 }
 0x3a9   : > { %v1011_v42 = vadd.f32 %v1828_v59, %v1010_v41 }
 0x3ab   : > { %v1038_v43 = vmax.f32 %v1011_v42, 0.0 }
 0x3ad   : > { %1744 = vmatmul.msk.f32.gmra.mxu2 %vm710_vm1, %v1038_v43 }
 0x3b0   : > { %v1013_v45 = vpop.f32.mrf.mxu1 }
 0x3b1   : > { %v1014_v51 = vadd.f32 %v1828_v59, %v1013_v45 }
 0x3b3   : > { %v1039_v46 = vmax.f32 %v1014_v51, 0.0 }
 0x3b5   : > { %1745 = vmatmul.msk.f32.gmra.mxu2 %vm710_vm1, %v1039_v46 }
 0x3b8   : > { %v1016_v47 = vpop.f32.mrf.mxu1 }
 0x3b9   : > { %v1017_v48 = vadd.f32 %v1828_v59, %v1016_v47 }
 0x3bb   : > { %v1040_v49 = vmax.f32 %v1017_v48, 0.0 }
 0x3bd   : > { %1746 = vmatmul.msk.f32.gmra.mxu2 %vm710_vm1, %v1040_v49 }
 0x3c0   : > { %v1019_v50 = vpop.f32.mrf.mxu1 }
 0x3c1   : > { %v1020_v52 = vadd.f32 %v1828_v59, %v1019_v50 }
 0x3c3   : > { %v1041_v53 = vmax.f32 %v1020_v52, 0.0 }
 0x3c5   : > { %1747 = vmatmul.msk.f32.gmra.mxu2 %vm710_vm1, %v1041_v53 }
 0x3c8   : > { %v1022_v54 = vpop.f32.mrf.mxu1 }
 0x3c9   : > { %v1023_v55 = vadd.f32 %v1828_v59, %v1022_v54 }
 0x3cb   : > { %v1042_v56 = vmax.f32 %v1023_v55, 0.0 }
 0x3cd   : > { %1748 = vmatmul.msk.f32.gmra.mxu2 %vm710_vm1, %v1042_v56 }
 0x3d0   : > { %v1025_v57 = vpop.f32.mrf.mxu1 }
 0x3d1   : > { %v1026_v58 = vadd.f32 %v1828_v59, %v1025_v57  ;;  %v1829_v59 = vld [vmem:[%s2360_s7 + $0x1] ss:$0 sm:$0xff] }
 0x3d3   : > { %v1043_v60 = vmax.f32 %v1026_v58, 0.0 }
 0x3d5   : > { %1749 = vmatmul.msk.f32.gmra.mxu2 %vm710_vm1, %v1043_v60 }
 0x3e0   : > { %v1123_v44 = vpop.f32.mrf.mxu2 }
 0x3e1   : > { %v1124_v57 = vadd.f32 %v1829_v59, %v1123_v44  ;;  %v483_v44 = vld [vmem:[%s2016_s15 + $0x120] sm:$0xff] }
 0x3e8   : > { %v1126_v61 = vpop.f32.mrf.mxu2 }
 0x3e9   : > { %v1127_v55 = vadd.f32 %v1829_v59, %v1126_v61 }
 0x3eb   : > { %v1172_v60 = vmax.f32 %v1127_v55, 0.0 }
 0x3f0   : > { %v1129_v62 = vpop.f32.mrf.mxu2 }
 0x3f1   : > { %v1130_v53 = vadd.f32 %v1829_v59, %v1129_v62 }
 0x3f3   : > { %v1173_v58 = vmax.f32 %v1130_v53, 0.0 }
 0x3f8   : > { %v1132_v63 = vpop.f32.mrf.mxu2 }
 0x3f9   : > { %v1133_v50 = vadd.f32 %v1829_v59, %v1132_v63  ;;  %v484_v63 = vld [vmem:[%s2016_s15 + $0x128] sm:$0xff] }
 0x3fb   : > { %v1174_v56 = vmax.f32 %v1133_v50, 0.0  ;;  %v493_v50 = vld [vmem:[%s2016_s15 + $0x170] sm:$0xff] }
 0x400   : > { %v1135_v0 = vpop.f32.mrf.mxu2 }
 0x401   : > { %v1136_v48 = vadd.f32 %v1829_v59, %v1135_v0 }
 0x403   : > { %v1175_v54 = vmax.f32 %v1136_v48, 0.0 }
 0x408   : > { %v1138_v1 = vpop.f32.mrf.mxu2 }
 0x409   : > { %v1139_v46 = vadd.f32 %v1829_v59, %v1138_v1  ;;  %v1171_v1 = vmax.f32 %v1124_v57, 0.0  ;;  %v1830_v57 = vld [vmem:[%s2358_s5 + $0x2] ss:$0 sm:$0xff] }
 0x40b   : > { %v1176_v52 = vmax.f32 %v1139_v46, 0.0  ;;  %v1772_v46 = vld [vmem:[%s2359_s6 + $0x88] sm:$0xff] }
 0x410   : > { %v1141_v2 = vpop.f32.mrf.mxu2 }
 0x411   : > { %v1142_v45 = vadd.f32 %v1829_v59, %v1141_v2 }
 0x413   : > { %v1177_v49 = vmax.f32 %v1142_v45, 0.0  ;;  %v1773_v45 = vld [vmem:[%s2359_s6 + $0x90] sm:$0xff] }
 0x418   : > { %v1144_v3 = vpop.f32.mrf.mxu2 }
 0x419   : > { %v1145_v42 = vadd.f32 %v1829_v59, %v1144_v3  ;;  %v485_v3 = vld [vmem:[%s2016_s15 + $0x130] sm:$0xff] }
 0x41b   : > { %v1178_v47 = vmax.f32 %v1145_v42, 0.0 }
 0x420   : > { %v1147_v4 = vpop.f32.mrf.mxu2 }
 0x421   : > { %v1148_v40 = vadd.f32 %v1829_v59, %v1147_v4 }
 0x423   : > { %v1179_v51 = vmax.f32 %v1148_v40, 0.0  ;;  %v491_v40 = vld [vmem:[%s2016_s15 + $0x160] sm:$0xff] }
 0x428   : > { %v1150_v5 = vpop.f32.mrf.mxu2 }
 0x429   : > { %v1151_v38 = vadd.f32 %v1829_v59, %v1150_v5 }
 0x42b   : > { %v1180_v43 = vmax.f32 %v1151_v38, 0.0  ;;  %v1776_v38 = vld [vmem:[%s2359_s6 + $0xa8] sm:$0xff] }
 0x430   : > { %v1153_v6 = vpop.f32.mrf.mxu2 }
 0x431   : > { %v1154_v36 = vadd.f32 %v1829_v59, %v1153_v6  ;;  %v486_v6 = vld [vmem:[%s2016_s15 + $0x138] sm:$0xff] }
 0x433   : > { %v1181_v41 = vmax.f32 %v1154_v36, 0.0 }
 0x438   : > { %v1156_v7 = vpop.f32.mrf.mxu2 }
 0x439   : > { %v1157_v30 = vadd.f32 %v1829_v59, %v1156_v7 }
 0x43b   : > { %v1182_v39 = vmax.f32 %v1157_v30, 0.0  ;;  %v490_v30 = vld [vmem:[%s2016_s15 + $0x158] sm:$0xff] }
 0x440   : > { %v1159_v8 = vpop.f32.mrf.mxu2 }
 0x441   : > { %v1160_v28 = vadd.f32 %v1829_v59, %v1159_v8 }
 0x443   : > { %v1183_v37 = vmax.f32 %v1160_v28, 0.0 }
 0x448   : > { %v1162_v9 = vpop.f32.mrf.mxu2 }
 0x449   : > { %v1163_v14 = vadd.f32 %v1829_v59, %v1162_v9  ;;  %v487_v9 = vld [vmem:[%s2016_s15 + $0x140] sm:$0xff] }
 0x44b   : > { %v1184_v32 = vmax.f32 %v1163_v14, 0.0  ;;  %v489_v14 = vld [vmem:[%s2016_s15 + $0x150] sm:$0xff] }
 0x450   : > { %v1165_v10 = vpop.f32.mrf.mxu2 }
 0x451   : > { %v1166_v12 = vadd.f32 %v1829_v59, %v1165_v10 }
 0x453   : > { %v1185_v29 = vmax.f32 %v1166_v12, 0.0 }
 0x458   : > { %v1168_v11 = vpop.f32.mrf.mxu2 }
 0x459   : > { %v1169_v13 = vadd.f32 %v1829_v59, %v1168_v11  ;;  %v488_v11 = vld [vmem:[%s2016_s15 + $0x148] sm:$0xff] }
 0x45b   : > { %v1186_v15 = vmax.f32 %v1169_v13, 0.0 }
 0x45d   : > { %1187 = vmatpush.msrb.mxu0 %v1186_v15 }
 0x45f   : > { %1188 = vmatpush.msrb.mxu0 %v1185_v29  ;;  %v1778_v29 = vld [vmem:[%s2359_s6 + $0xb8] sm:$0xff] }
 0x460   : > { %1809 = vmatpush.msra.mxu1 %v1778_v29 }
 0x461   : > { %1189 = vmatpush.msrb.mxu0 %v1184_v32 }
 0x463   : > { %1190 = vmatpush.msrb.mxu0 %v1183_v37  ;;  %v1777_v37 = vld [vmem:[%s2359_s6 + $0xb0] sm:$0xff] }
 0x464   : > { %1810 = vmatpush.msra.mxu1 %v1777_v37 }
 0x465   : > { %1191 = vmatpush.msrb.mxu0 %v1182_v39  ;;  %v1775_v39 = vld [vmem:[%s2359_s6 + $0xa0] sm:$0xff] }
 0x466   : > { %1811 = vmatpush.msra.mxu1 %v1776_v38 }
 0x467   : > { %1192 = vmatpush.msrb.mxu0 %v1181_v41  ;;  %v1774_v41 = vld [vmem:[%s2359_s6 + $0x98] sm:$0xff] }
 0x468   : > { %1812 = vmatpush.msra.mxu1 %v1775_v39 }
 0x469   : > { %1193 = vmatpush.msrb.mxu0 %v1180_v43 }
 0x46a   : > { %1813 = vmatpush.msra.mxu1 %v1774_v41 }
 0x46b   : > { %1194 = vmatpush.msrb.mxu0 %v1179_v51  ;;  %v492_v51 = vld [vmem:[%s2016_s15 + $0x168] sm:$0xff] }
 0x46c   : > { %1814 = vmatpush.msra.mxu1 %v1773_v45 }
 0x46d   : > { %1195 = vmatpush.msrb.mxu0 %v1178_v47 }
 0x46e   : > { %1815 = vmatpush.msra.mxu1 %v1772_v46 }
 0x46f   : > { %1196 = vmatpush.msrb.mxu0 %v1177_v49  ;;  %v1771_v49 = vld [vmem:[%s2359_s6 + $0x80] sm:$0xff] }
 0x470   : > { %1816 = vmatpush.msra.mxu1 %v1771_v49 }
 0x471   : > { %1197 = vmatpush.msrb.mxu0 %v1176_v52 }
 0x473   : > { %1198 = vmatpush.msrb.mxu0 %v1175_v54  ;;  %v494_v54 = vld [vmem:[%s2016_s15 + $0x178] sm:$0xff] }
 0x475   : > { %1199 = vmatpush.msrb.mxu0 %v1174_v56 }
 0x477   : > { %1200 = vmatpush.msrb.mxu0 %v1173_v58 }
 0x479   : > { %1201 = vmatpush.msrb.mxu0 %v1172_v60 }
 0x47b   : > { %1202 = vmatpush.msrb.mxu0 %v1171_v1 }
 0x47c   : > { %1203 = vmatmul.f32.vlgmr.msrb.gmra.mxu0 %v1938_v16  ;;  %v1753_v16 = vld [vmem:[%s2357_s4 + $0x58] sm:$0xff] }
 0x47d   : > { %1322 = vmatpush.msra.mxu3 %v1753_v16  ;;  %1461 = vmatpush.msra.mxu0 %v1778_v29 }
 0x47f   : > { %1462 = vmatpush.msra.mxu0 %v1777_v37 }
 0x481   : > { %1463 = vmatpush.msra.mxu0 %v1776_v38 }
 0x483   : > { %1464 = vmatpush.msra.mxu0 %v1775_v39 }
 0x484   : > { %1206 = vmatmul.f32.gmra.mxu0 %v1942_v17  ;;  %v1752_v17 = vld [vmem:[%s2357_s4 + $0x50] sm:$0xff] }
 0x485   : > { %1323 = vmatpush.msra.mxu3 %v1752_v17  ;;  %1465 = vmatpush.msra.mxu0 %v1774_v41 }
 0x487   : > { %1466 = vmatpush.msra.mxu0 %v1773_v45 }
 0x489   : > { %1467 = vmatpush.msra.mxu0 %v1772_v46 }
 0x48b   : > { %1468 = vmatpush.msra.mxu0 %v1771_v49 }
 0x48c   : > { %1209 = vmatmul.f32.gmra.mxu0 %v1946_v18  ;;  %v1751_v18 = vld [vmem:[%s2357_s4 + $0x48] sm:$0xff] }
 0x48d   : > { %1324 = vmatpush.msra.mxu3 %v1751_v18 }
 0x494   : > { %1212 = vmatmul.f32.gmra.mxu0 %v1950_v19  ;;  %v1750_v19 = vld [vmem:[%s2357_s4 + $0x40] sm:$0xff] }
 0x495   : > { %1325 = vmatpush.msra.mxu3 %v1750_v19 }
 0x49c   : > { %1215 = vmatmul.f32.gmra.mxu0 %v1954_v20  ;;  %v479_v20 = vld [vmem:[%s2016_s15 + $0x100] sm:$0xff] }
 0x4a4   : > { %1218 = vmatmul.f32.gmra.mxu0 %v1958_v21 }
 0x4ac   : > { %1221 = vmatmul.f32.gmra.mxu0 %v1962_v22 }
 0x4b4   : > { %1224 = vmatmul.f32.gmra.mxu0 %v1966_v23  ;;  %v480_v23 = vld [vmem:[%s2016_s15 + $0x108] sm:$0xff] }
 0x4bc   : > { %1227 = vmatmul.f32.gmra.mxu0 %v1970_v24 }
 0x4c4   : > { %1230 = vmatmul.f32.gmra.mxu0 %v1974_v25 }
 0x4cc   : > { %1233 = vmatmul.f32.gmra.mxu0 %v1978_v26  ;;  %v481_v26 = vld [vmem:[%s2016_s15 + $0x110] sm:$0xff] }
 0x4d4   : > { %1236 = vmatmul.f32.gmra.mxu0 %v1982_v27 }
 0x4dc   : > { %1239 = vmatmul.f32.gmra.mxu0 %v1995_v31 }
 0x4e4   : > { %1242 = vmatmul.f32.gmra.mxu0 %v2002_v33  ;;  %v482_v33 = vld [vmem:[%s2016_s15 + $0x118] sm:$0xff] }
 0x4ec   : > { %1245 = vmatmul.f32.gmra.mxu0 %v2006_v34 }
 0x4f4   : > { %1248 = vmatmul.f32.gmra.mxu0 %v2011_v35 }
 0x4f9   : > { %v1204_v21 = vpop.f32.mrf.mxu0 }
 0x4fa   : > { %v1205_v22 = vadd.f32 %v1204_v21, %v479_v20 }
 0x4fc   : > { %1755 = vmatmul.msk.f32.vlgmr.msra.gmra.mxu3 %vm568_vm0, %v1205_v22 }
 0x501   : > { %v1207_v24 = vpop.f32.mrf.mxu0 }
 0x502   : > { %v1208_v25 = vadd.f32 %v1207_v24, %v480_v23 }
 0x504   : > { %1756 = vmatmul.msk.f32.gmra.mxu3 %vm568_vm0, %v1208_v25 }
 0x509   : > { %v1210_v27 = vpop.f32.mrf.mxu0 }
 0x50a   : > { %v1211_v31 = vadd.f32 %v1210_v27, %v481_v26 }
 0x50c   : > { %1757 = vmatmul.msk.f32.gmra.mxu3 %vm568_vm0, %v1211_v31 }
 0x511   : > { %v1213_v34 = vpop.f32.mrf.mxu0 }
 0x512   : > { %v1214_v35 = vadd.f32 %v1213_v34, %v482_v33 }
 0x514   : > { %1758 = vmatmul.msk.f32.gmra.mxu3 %vm568_vm0, %v1214_v35 }
 0x519   : > { %v1216_v61 = vpop.f32.mrf.mxu0 }
 0x51a   : > { %v1217_v62 = vadd.f32 %v1216_v61, %v483_v44 }
 0x51c   : > { %1759 = vmatmul.msk.f32.gmra.mxu3 %vm568_vm0, %v1217_v62 }
 0x521   : > { %v1219_v0 = vpop.f32.mrf.mxu0 }
 0x522   : > { %v1220_v2 = vadd.f32 %v1219_v0, %v484_v63 }
 0x524   : > { %1760 = vmatmul.msk.f32.gmra.mxu3 %vm568_vm0, %v1220_v2 }
 0x529   : > { %v1222_v4 = vpop.f32.mrf.mxu0 }
 0x52a   : > { %v1223_v5 = vadd.f32 %v1222_v4, %v485_v3 }
 0x52c   : > { %1761 = vmatmul.msk.f32.gmra.mxu3 %vm568_vm0, %v1223_v5 }
 0x531   : > { %v1225_v7 = vpop.f32.mrf.mxu0 }
 0x532   : > { %v1226_v8 = vadd.f32 %v1225_v7, %v486_v6 }
 0x534   : > { %1762 = vmatmul.msk.f32.gmra.mxu3 %vm568_vm0, %v1226_v8 }
 0x539   : > { %v1228_v10 = vpop.f32.mrf.mxu0 }
 0x53a   : > { %v1229_v59 = vadd.f32 %v1228_v10, %v487_v9 }
 0x53c   : > { %1763 = vmatmul.msk.f32.gmra.mxu3 %vm568_vm0, %v1229_v59 }
 0x541   : > { %v1231_v12 = vpop.f32.mrf.mxu0 }
 0x542   : > { %v1232_v13 = vadd.f32 %v1231_v12, %v488_v11 }
 0x544   : > { %1764 = vmatmul.msk.f32.gmra.mxu3 %vm568_vm0, %v1232_v13 }
 0x549   : > { %v1234_v15 = vpop.f32.mrf.mxu0 }
 0x54a   : > { %v1235_v28 = vadd.f32 %v1234_v15, %v489_v14 }
 0x54c   : > { %1765 = vmatmul.msk.f32.gmra.mxu3 %vm568_vm0, %v1235_v28 }
 0x551   : > { %v1237_v32 = vpop.f32.mrf.mxu0 }
 0x552   : > { %v1238_v36 = vadd.f32 %v1237_v32, %v490_v30 }
 0x554   : > { %1766 = vmatmul.msk.f32.gmra.mxu3 %vm568_vm0, %v1238_v36 }
 0x559   : > { %v1240_v42 = vpop.f32.mrf.mxu0 }
 0x55a   : > { %v1241_v43 = vadd.f32 %v1240_v42, %v491_v40 }
 0x55c   : > { %1767 = vmatmul.msk.f32.gmra.mxu3 %vm568_vm0, %v1241_v43 }
 0x561   : > { %v1243_v47 = vpop.f32.mrf.mxu0 }
 0x562   : > { %v1244_v48 = vadd.f32 %v1243_v47, %v492_v51 }
 0x564   : > { %1768 = vmatmul.msk.f32.gmra.mxu3 %vm568_vm0, %v1244_v48 }
 0x569   : > { %v1246_v52 = vpop.f32.mrf.mxu0 }
 0x56a   : > { %v1247_v53 = vadd.f32 %v1246_v52, %v493_v50 }
 0x56c   : > { %1769 = vmatmul.msk.f32.gmra.mxu3 %vm568_vm0, %v1247_v53 }
 0x571   : > { %v1249_v55 = vpop.f32.mrf.mxu0 }
 0x572   : > { %v1250_v56 = vadd.f32 %v1249_v55, %v494_v54 }
 0x574   : > { %1770 = vmatmul.msk.f32.gmra.mxu3 %vm568_vm0, %v1250_v56  ;;  %v1831_v56 = vld [vmem:[%s2360_s7 + $0x2] ss:$0 sm:$0xff] }
 0x57f   : > { %v1327_v58 = vpop.f32.mrf.mxu3 }
 0x580   : > { %v1328_v60 = vadd.f32 %v1830_v57, %v1327_v58 }
 0x582   : > { %v1375_v1 = vmax.f32 %v1328_v60, 0.0  ;;  %v1542_v60 = vld [vmem:[%s2361_s8 + $0x18] sm:$0xff] }
 0x583   : > { %1562 = vmatpush.msrb.mxu0 %v1542_v60 }
 0x584   : > { %1780 = vmatmul.msk.f32.vlgmr.msra.gmra.mxu0 %vm710_vm1, %v1375_v1  ;;  %v1541_v1 = vld [vmem:[%s2361_s8 + $0x10] sm:$0xff] }
 0x585   : > { %1563 = vmatpush.msrb.mxu0 %v1541_v1 }
 0x587   : > { %v1330_v16 = vpop.f32.mrf.mxu3 }
 0x588   : > { %v1331_v17 = vadd.f32 %v1830_v57, %v1330_v16 }
 0x58a   : > { %v1376_v18 = vmax.f32 %v1331_v17, 0.0  ;;  %v1540_v17 = vld [vmem:[%s2361_s8 + $0x8] sm:$0xff] }
 0x58b   : > { %1564 = vmatpush.msrb.mxu0 %v1540_v17 }
 0x58c   : > { %1781 = vmatmul.msk.f32.vlgmr.msra.gmra.mxu1 %vm710_vm1, %v1376_v18 }
 0x58f   : > { %v1333_v19 = vpop.f32.mrf.mxu3 }
 0x590   : > { %v1334_v20 = vadd.f32 %v1830_v57, %v1333_v19  ;;  %v1539_v19 = vld [vmem:[%s2361_s8] sm:$0xff] }
 0x591   : > { %1565 = vmatpush.msrb.mxu0 %v1539_v19 }
 0x592   : > { %v1377_v21 = vmax.f32 %v1334_v20, 0.0 }
 0x594   : > { %1782 = vmatmul.msk.f32.gmra.mxu1 %vm710_vm1, %v1377_v21 }
 0x597   : > { %v1336_v22 = vpop.f32.mrf.mxu3 }
 0x598   : > { %v1337_v23 = vadd.f32 %v1830_v57, %v1336_v22 }
 0x59a   : > { %v1378_v24 = vmax.f32 %v1337_v23, 0.0 }
 0x59c   : > { %1783 = vmatmul.msk.f32.gmra.mxu1 %vm710_vm1, %v1378_v24 }
 0x59f   : > { %v1339_v25 = vpop.f32.mrf.mxu3 }
 0x5a0   : > { %v1340_v26 = vadd.f32 %v1830_v57, %v1339_v25 }
 0x5a2   : > { %v1379_v27 = vmax.f32 %v1340_v26, 0.0 }
 0x5a4   : > { %1784 = vmatmul.msk.f32.gmra.mxu1 %vm710_vm1, %v1379_v27 }
 0x5a7   : > { %v1342_v31 = vpop.f32.mrf.mxu3 }
 0x5a8   : > { %v1343_v33 = vadd.f32 %v1830_v57, %v1342_v31 }
 0x5aa   : > { %v1380_v34 = vmax.f32 %v1343_v33, 0.0 }
 0x5ac   : > { %1785 = vmatmul.msk.f32.gmra.mxu1 %vm710_vm1, %v1380_v34 }
 0x5af   : > { %v1345_v35 = vpop.f32.mrf.mxu3 }
 0x5b0   : > { %v1346_v44 = vadd.f32 %v1830_v57, %v1345_v35 }
 0x5b2   : > { %v1381_v61 = vmax.f32 %v1346_v44, 0.0 }
 0x5b4   : > { %1786 = vmatmul.msk.f32.gmra.mxu1 %vm710_vm1, %v1381_v61 }
 0x5b7   : > { %v1348_v62 = vpop.f32.mrf.mxu3 }
 0x5b8   : > { %v1349_v63 = vadd.f32 %v1830_v57, %v1348_v62  ;;  %v1518_v62 = vld [vmem:[%s410_s17] sm:$0xf] }
 0x5ba   : > { %v1382_v0 = vmax.f32 %v1349_v63, 0.0 }
 0x5bc   : > { %1787 = vmatmul.msk.f32.gmra.mxu1 %vm710_vm1, %v1382_v0  ;;  %v1832_v0 = vld [vmem:[%s2362_s9] ss:$0 sm:$0xff] }
 0x5bf   : > { %v1351_v2 = vpop.f32.mrf.mxu3 }
 0x5c0   : > { %v1352_v3 = vadd.f32 %v1830_v57, %v1351_v2 }
 0x5c2   : > { %v1383_v4 = vmax.f32 %v1352_v3, 0.0 }
 0x5c4   : > { %1788 = vmatmul.msk.f32.gmra.mxu1 %vm710_vm1, %v1383_v4 }
 0x5c7   : > { %v1354_v5 = vpop.f32.mrf.mxu3 }
 0x5c8   : > { %v1355_v6 = vadd.f32 %v1830_v57, %v1354_v5 }
 0x5ca   : > { %v1384_v7 = vmax.f32 %v1355_v6, 0.0 }
 0x5cc   : > { %1789 = vmatmul.msk.f32.gmra.mxu1 %vm710_vm1, %v1384_v7 }
 0x5cf   : > { %v1357_v8 = vpop.f32.mrf.mxu3 }
 0x5d0   : > { %v1358_v9 = vadd.f32 %v1830_v57, %v1357_v8 }
 0x5d2   : > { %v1385_v10 = vmax.f32 %v1358_v9, 0.0 }
 0x5d4   : > { %1790 = vmatmul.msk.f32.gmra.mxu1 %vm710_vm1, %v1385_v10 }
 0x5d7   : > { %v1360_v59 = vpop.f32.mrf.mxu3 }
 0x5d8   : > { %v1361_v11 = vadd.f32 %v1830_v57, %v1360_v59 }
 0x5da   : > { %v1386_v12 = vmax.f32 %v1361_v11, 0.0 }
 0x5dc   : > { %1791 = vmatmul.msk.f32.gmra.mxu1 %vm710_vm1, %v1386_v12 }
 0x5df   : > { %v1363_v13 = vpop.f32.mrf.mxu3 }
 0x5e0   : > { %v1364_v14 = vadd.f32 %v1830_v57, %v1363_v13 }
 0x5e2   : > { %v1387_v15 = vmax.f32 %v1364_v14, 0.0 }
 0x5e4   : > { %1792 = vmatmul.msk.f32.gmra.mxu1 %vm710_vm1, %v1387_v15 }
 0x5e7   : > { %v1366_v28 = vpop.f32.mrf.mxu3 }
 0x5e8   : > { %v1367_v29 = vadd.f32 %v1830_v57, %v1366_v28 }
 0x5ea   : > { %v1388_v30 = vmax.f32 %v1367_v29, 0.0 }
 0x5ec   : > { %1793 = vmatmul.msk.f32.gmra.mxu1 %vm710_vm1, %v1388_v30 }
 0x5ef   : > { %v1369_v32 = vpop.f32.mrf.mxu3 }
 0x5f0   : > { %v1370_v36 = vadd.f32 %v1830_v57, %v1369_v32 }
 0x5f2   : > { %v1389_v37 = vmax.f32 %v1370_v36, 0.0 }
 0x5f4   : > { %1794 = vmatmul.msk.f32.gmra.mxu1 %vm710_vm1, %v1389_v37 }
 0x5f7   : > { %v1372_v38 = vpop.f32.mrf.mxu3 }
 0x5f8   : > { %v1373_v39 = vadd.f32 %v1830_v57, %v1372_v38 }
 0x5fa   : > { %v1390_v40 = vmax.f32 %v1373_v39, 0.0 }
 0x5fc   : > { %1795 = vmatmul.msk.f32.gmra.mxu1 %vm710_vm1, %v1390_v40 }
 0x601   : > { %v1470_v35 = vpop.f32.mrf.mxu0 }
 0x602   : > { %v1471_v61 = vadd.f32 %v1831_v56, %v1470_v35 }
 0x609   : > { %v1473_v41 = vpop.f32.mrf.mxu1 }
 0x60a   : > { %v1474_v44 = vadd.f32 %v1831_v56, %v1473_v41 }
 0x611   : > { %v1476_v42 = vpop.f32.mrf.mxu1 }
 0x612   : > { %v1477_v34 = vadd.f32 %v1831_v56, %v1476_v42 }
 0x619   : > { %v1479_v43 = vpop.f32.mrf.mxu1 }
 0x61a   : > { %v1480_v33 = vadd.f32 %v1831_v56, %v1479_v43 }
 0x621   : > { %v1482_v45 = vpop.f32.mrf.mxu1 }
 0x622   : > { %v1483_v31 = vadd.f32 %v1831_v56, %v1482_v45 }
 0x629   : > { %v1485_v51 = vpop.f32.mrf.mxu1 }
 0x62a   : > { %v1486_v27 = vadd.f32 %v1831_v56, %v1485_v51 }
 0x631   : > { %v1488_v46 = vpop.f32.mrf.mxu1 }
 0x632   : > { %v1489_v26 = vadd.f32 %v1831_v56, %v1488_v46 }
 0x639   : > { %v1491_v47 = vpop.f32.mrf.mxu1 }
 0x63a   : > { %v1492_v25 = vadd.f32 %v1831_v56, %v1491_v47 }
 0x641   : > { %v1494_v48 = vpop.f32.mrf.mxu1 }
 0x642   : > { %v1495_v24 = vadd.f32 %v1831_v56, %v1494_v48 }
 0x649   : > { %v1497_v49 = vpop.f32.mrf.mxu1 }
 0x64a   : > { %v1498_v23 = vadd.f32 %v1831_v56, %v1497_v49 }
 0x651   : > { %v1500_v50 = vpop.f32.mrf.mxu1 }
 0x652   : > { %v1501_v22 = vadd.f32 %v1831_v56, %v1500_v50 }
 0x659   : > { %v1503_v52 = vpop.f32.mrf.mxu1 }
 0x65a   : > { %v1504_v21 = vadd.f32 %v1831_v56, %v1503_v52 }
 0x661   : > { %v1506_v53 = vpop.f32.mrf.mxu1 }
 0x662   : > { %v1507_v20 = vadd.f32 %v1831_v56, %v1506_v53 }
 0x669   : > { %v1509_v54 = vpop.f32.mrf.mxu1 }
 0x66a   : > { %v1510_v18 = vadd.f32 %v1831_v56, %v1509_v54 }
 0x671   : > { %v1512_v55 = vpop.f32.mrf.mxu1 }
 0x672   : > { %v1513_v16 = vadd.f32 %v1831_v56, %v1512_v55 }
 0x679   : > { %v1515_v57 = vpop.f32.mrf.mxu1 }
 0x67a   : > { %v1516_v58 = vadd.f32 %v1831_v56, %v1515_v57 }
 0x67c   : > { %1519 = vmatpush.msrb.mxu2 %v1516_v58 }
 0x67e   : > { %1520 = vmatpush.msrb.mxu2 %v1513_v16 }
 0x680   : > { %1521 = vmatpush.msrb.mxu2 %v1510_v18 }
 0x682   : > { %1522 = vmatpush.msrb.mxu2 %v1507_v20 }
 0x684   : > { %1523 = vmatpush.msrb.mxu2 %v1504_v21 }
 0x686   : > { %1524 = vmatpush.msrb.mxu2 %v1501_v22 }
 0x688   : > { %1525 = vmatpush.msrb.mxu2 %v1498_v23 }
 0x68a   : > { %1526 = vmatpush.msrb.mxu2 %v1495_v24 }
 0x68c   : > { %1527 = vmatpush.msrb.mxu2 %v1492_v25 }
 0x68e   : > { %1528 = vmatpush.msrb.mxu2 %v1489_v26 }
 0x690   : > { %1529 = vmatpush.msrb.mxu2 %v1486_v27 }
 0x692   : > { %1530 = vmatpush.msrb.mxu2 %v1483_v31 }
 0x694   : > { %1531 = vmatpush.msrb.mxu2 %v1480_v33 }
 0x696   : > { %1532 = vmatpush.msrb.mxu2 %v1477_v34 }
 0x698   : > { %1533 = vmatpush.msrb.mxu2 %v1474_v44 }
 0x69a   : > { %1534 = vmatpush.msrb.mxu2 %v1471_v61 }
 0x69b   : > { %1535 = vmatmul.f32.vlgmr.msrb.gmra.mxu2 %v1518_v62 }
 0x71e   : > { %v1536_v63 = vpop.f32.mrf.mxu2 }
 0x71f   : > { %1796 = vmatmul.msk.f32.vlgmr.msrb.gmra.mxu0 %vm568_vm0, %v1536_v63 }
 0x79c   : > { %v1567_v2 = vpop.f32.mrf.mxu0 }
 0x79d   : > { %v1568_v3 = vadd.f32 %v1832_v0, %v1567_v2 }
 0x79f   : > { %1570 = vst [vmem:[%s414_s21] sm:$0xf] %v1568_v3 }
 0x7a0 PF: > { %s20_s13 = sadd.s32 1, %s1839_s13  }
 0x7a1   : > { %p17_p4 = scmp.ge.s32.totalorder %s20_s13, 6  }
 0x7a3   :  { %19 = sbr.rel (!%p17_p4) target bundleno = 1 (0x1), region = 107 }

</bundles_post_ra>
